<compile_context>
chip_gen: v7x
topology: tpu7x:2x2x1
jax: 0.10.0
libtpu: 0.0.40
codegen_flags: <defaults>
</compile_context>

<pallas_src>
import jax
import jax.numpy as jnp
from jax.experimental import pallas as pl
from jax.experimental.pallas import tpu as pltpu  # noqa: F401  (no grid/compiler params needed at this size)

# Small stand-ins for hp.* config values.
NFILTERS = 24     # hp.data.nfilters
HIDDEN = 32       # hp.model.hidden
PROJ = 16         # hp.model.proj
NUM_LAYERS = 2    # hp.model.num_layer
SEQ = 8           # time steps per utterance
BATCH = 2         # batch (dim 1 of the seq-first input)
NSEQ = 8          # independent utterances, folded into the sublane/batch dim


def speech_embedder_kernel(x_ref, *refs):
    """refs = [w0T, b0, whh0T] + [wihT_l, whhT_l, b_l : l in 1..L-1] + [wpT, bp] + [out_ref]."""
    out_ref = refs[-1]
    w_refs = refs[:-1]

    H, P, T = HIDDEN, PROJ, SEQ
    NS = x_ref.shape[0] // T                 # folded batch (= padded NSEQ), static

    w0 = w_refs[0][...]                      # (F, 4H)  pre-transposed W_ih layer 0
    b0 = w_refs[1][...]                      # (1, 4H)  fused b_ih0 + b_hh0
    whh0 = w_refs[2][...]                    # (H, 4H)  pre-transposed W_hh layer 0
    wih_l, whh_l, b_l = [], [], []
    idx = 3
    for _ in range(1, NUM_LAYERS):
        wih_l.append(w_refs[idx][...])                                    # (H, 4H)
        whh_l.append(w_refs[idx + 1][...])                                # (H, 4H)
        b_l.append(jnp.broadcast_to(w_refs[idx + 2][...], (NS, 4 * H)))   # hoisted broadcast
        idx += 3
    wp = w_refs[idx][...]                                                 # (H, P)
    bp = jnp.broadcast_to(w_refs[idx + 1][...], (NS, P))                  # hoisted broadcast

    # Hoisted layer-0 input projection: one matmul for all timesteps & sequences,
    # off the serial recurrence path.  (T*NS, F) @ (F, 4H) -> (T*NS, 4H)
    pre0 = jnp.dot(x_ref[...], w0, preferred_element_type=jnp.float32) + b0

    def lstm_cell(gates, c_prev):
        # sigmoid(x) = 0.5*tanh(0.5x) + 0.5 : one 128-lane EUP push serves the
        # i/f/o gates; the g block gets its own 32-lane tanh; +1 tanh for c_new.
        th = jnp.tanh(0.5 * gates)                       # (NS, 4H), 1 EUP push
        i_g = 0.5 * th[:, 0 * H:1 * H] + 0.5
        f_g = 0.5 * th[:, 1 * H:2 * H] + 0.5
        o_g = 0.5 * th[:, 3 * H:4 * H] + 0.5
        g_g = jnp.tanh(gates[:, 2 * H:3 * H])            # (NS, H), 1 EUP push
        c_new = f_g * c_prev + i_g * g_g
        h_new = o_g * jnp.tanh(c_new)                    # 1 EUP push
        return h_new, c_new

    h = [jnp.zeros((NS, H), jnp.float32) for _ in range(NUM_LAYERS)]
    c = [jnp.zeros((NS, H), jnp.float32) for _ in range(NUM_LAYERS)]
    ys = []

    # Static unroll over T (compile-time constant): full LLO visibility, h/c
    # stay in vregs, pre0 slices start at sublane offsets t*NS (multiples of 8).
    for t in range(T):
        # Layer 0: precomputed input gates + recurrent matmul only.
        gates0 = pre0[t * NS:(t + 1) * NS, :] + jnp.dot(
            h[0], whh0, preferred_element_type=jnp.float32)
        h[0], c[0] = lstm_cell(gates0, c[0])
        # Layers >= 1: two tiny matmuls, no per-step cross-lane concatenate.
        for l in range(1, NUM_LAYERS):
            gates = (jnp.dot(h[l - 1], wih_l[l - 1], preferred_element_type=jnp.float32)
                     + jnp.dot(h[l], whh_l[l - 1], preferred_element_type=jnp.float32)
                     + b_l[l - 1])
            h[l], c[l] = lstm_cell(gates, c[l])
        # Per-timestep projection of the top layer (off the recurrent dep chain;
        # MXU is otherwise idle):  (NS, H) @ (H, P) -> (NS, P)
        ys.append(jnp.dot(h[NUM_LAYERS - 1], wp,
                          preferred_element_type=jnp.float32) + bp)

    # Lane-dense (NS, T*P) = (8, 128) slab: y[s, t*P:(t+1)*P] is timestep t.
    y = jnp.concatenate(ys, axis=1)
    # Per-sequence Frobenius norm (each row holds that utterance's full (T, P)).
    ss = jnp.sum(y * y, axis=1, keepdims=True)           # (NS, 1)
    out_ref[...] = y / jnp.sqrt(ss)


def init_params(key):
    """Deterministic parameter init (xavier-normal weights, zero LSTM biases),
    matching the PyTorch module's parameter shapes."""
    params = {}
    in_dim = NFILTERS
    for l in range(NUM_LAYERS):
        key, k1, k2 = jax.random.split(key, 3)
        std_ih = (2.0 / (4 * HIDDEN + in_dim)) ** 0.5
        std_hh = (2.0 / (4 * HIDDEN + HIDDEN)) ** 0.5
        params[f"wih{l}"] = std_ih * jax.random.normal(k1, (4 * HIDDEN, in_dim), jnp.float32)
        params[f"whh{l}"] = std_hh * jax.random.normal(k2, (4 * HIDDEN, HIDDEN), jnp.float32)
        params[f"bih{l}"] = jnp.zeros((1, 4 * HIDDEN), jnp.float32)
        params[f"bhh{l}"] = jnp.zeros((1, 4 * HIDDEN), jnp.float32)
        in_dim = HIDDEN
    key, kp, kb = jax.random.split(key, 3)
    bound = 1.0 / (HIDDEN ** 0.5)
    params["wp"] = jax.random.uniform(kp, (PROJ, HIDDEN), jnp.float32, -bound, bound)
    params["bp"] = jax.random.uniform(kb, (1, PROJ), jnp.float32, -bound, bound)
    return params


@jax.jit
def speech_embedder(x, params):
    """x: (NSEQ, T, B, F) -- NSEQ independent utterances; each is one module
    forward pass.  Returns (NSEQ, T, P)."""
    nseq, T, B, F = x.shape
    H, P, L = HIDDEN, PROJ, NUM_LAYERS

    # Only batch column B-1 feeds the output (x[:, x.size(1)-1]); LSTM batch
    # elements are independent, so slicing up front is bit-identical.
    x_last = x[:, :, B - 1, :].astype(jnp.float32)               # (NSEQ, T, F)

    # Pad the folded batch to a multiple of 8 so it fills the f32 sublanes and
    # the per-timestep pre0 slices are 8-aligned (no-op for NSEQ=8).
    ns = ((nseq + 7) // 8) * 8
    if ns != nseq:
        x_last = jnp.pad(x_last, ((0, ns - nseq), (0, 0), (0, 0)))

    # Time-major fold: row (t*ns + s) of x2 is sequence s at timestep t.
    x2 = jnp.transpose(x_last, (1, 0, 2)).reshape(T * ns, F)

    # XLA-side weight prep: pre-transpose, fuse biases.
    weights = [
        params["wih0"].T,                    # (F, 4H)
        params["bih0"] + params["bhh0"],     # (1, 4H)
        params["whh0"].T,                    # (H, 4H)
    ]
    for l in range(1, L):
        weights += [params[f"wih{l}"].T,                     # (H, 4H)
                    params[f"whh{l}"].T,                     # (H, 4H)
                    params[f"bih{l}"] + params[f"bhh{l}"]]   # (1, 4H)
    weights += [params["wp"].T,              # (H, P)
                params["bp"]]                # (1, P)

    # Single gridless call: everything (inputs, weights, (8,128) output) lives
    # in VMEM (<1 MiB footprint on every generation); no grid-step overhead.
    out = pl.pallas_call(
        speech_embedder_kernel,
        out_shape=jax.ShapeDtypeStruct((ns, T * P), jnp.float32),
    )(x2, *weights)

    # Lane-dense (ns, T*P) slab -> (nseq, T, P) on the XLA side.
    return out[:nseq].reshape(nseq, T, P)


def reference(x, params):
    """Pure-JAX reference of the PyTorch forward pass, applied per sequence
    (full batch LSTM, then select batch B-1, project, global-norm divide)."""
    def one(xs):
        T, B, _ = xs.shape
        H = HIDDEN
        layer_in = xs
        for l in range(NUM_LAYERS):
            wih, whh = params[f"wih{l}"], params[f"whh{l}"]
            b_ih, b_hh = params[f"bih{l}"][0], params[f"bhh{l}"][0]
            h = jnp.zeros((B, H), jnp.float32)
            c = jnp.zeros((B, H), jnp.float32)
            outs = []
            for t in range(T):
                gates = layer_in[t] @ wih.T + b_ih + h @ whh.T + b_hh
                i = jax.nn.sigmoid(gates[:, :H])
                f = jax.nn.sigmoid(gates[:, H:2 * H])
                g = jnp.tanh(gates[:, 2 * H:3 * H])
                o = jax.nn.sigmoid(gates[:, 3 * H:4 * H])
                c = f * c + i * g
                h = o * jnp.tanh(c)
                outs.append(h)
            layer_in = jnp.stack(outs, axis=0)
        y = layer_in[:, B - 1]
        y = y @ params["wp"].T + params["bp"][0]
        return y / jnp.sqrt(jnp.sum(y * y))

    return jnp.stack([one(x[s]) for s in range(x.shape[0])], axis=0)


if __name__ == "__main__":
    key = jax.random.PRNGKey(0)
    key, kx, kp = jax.random.split(key, 3)
    x = jax.random.normal(kx, (NSEQ, SEQ, BATCH, NFILTERS), jnp.float32)
    params = init_params(kp)

    out = jax.block_until_ready(speech_embedder(x, params))

    ref = reference(x, params)
    assert out.shape == (NSEQ, SEQ, PROJ)
    assert jnp.allclose(out, ref, atol=1e-4, rtol=1e-3), "mismatch vs reference"
    print("KERNEL_OK")
</pallas_src>

<mosaic_0001>
module attributes {stable_mosaic.version = 11 : i64} {
  func.func @speech_embedder_kernel(%arg0: memref<64x24xf32, #tpu.memory_space<vmem>>, %arg1: memref<24x128xf32, #tpu.memory_space<vmem>>, %arg2: memref<1x128xf32, #tpu.memory_space<vmem>>, %arg3: memref<32x128xf32, #tpu.memory_space<vmem>>, %arg4: memref<32x128xf32, #tpu.memory_space<vmem>>, %arg5: memref<32x128xf32, #tpu.memory_space<vmem>>, %arg6: memref<1x128xf32, #tpu.memory_space<vmem>>, %arg7: memref<32x16xf32, #tpu.memory_space<vmem>>, %arg8: memref<1x16xf32, #tpu.memory_space<vmem>>, %arg9: memref<8x128xf32, #tpu.memory_space<vmem>>) attributes {dimension_semantics = [], scalar_prefetch = 0 : i64, scratch_operands = 0 : i64, tpu.core_type = #tpu.core_type<tc>} {
    %c0 = arith.constant 0 : index
    %c0_0 = arith.constant 0 : index
    %0 = vector.load %arg1[%c0, %c0_0] : memref<24x128xf32, #tpu.memory_space<vmem>>, vector<24x128xf32>
    %c0_1 = arith.constant 0 : index
    %c0_2 = arith.constant 0 : index
    %1 = vector.load %arg2[%c0_1, %c0_2] : memref<1x128xf32, #tpu.memory_space<vmem>>, vector<1x128xf32>
    %c0_3 = arith.constant 0 : index
    %c0_4 = arith.constant 0 : index
    %2 = vector.load %arg3[%c0_3, %c0_4] : memref<32x128xf32, #tpu.memory_space<vmem>>, vector<32x128xf32>
    %c0_5 = arith.constant 0 : index
    %c0_6 = arith.constant 0 : index
    %3 = vector.load %arg4[%c0_5, %c0_6] : memref<32x128xf32, #tpu.memory_space<vmem>>, vector<32x128xf32>
    %c0_7 = arith.constant 0 : index
    %c0_8 = arith.constant 0 : index
    %4 = vector.load %arg5[%c0_7, %c0_8] : memref<32x128xf32, #tpu.memory_space<vmem>>, vector<32x128xf32>
    %c0_9 = arith.constant 0 : index
    %c0_10 = arith.constant 0 : index
    %5 = vector.load %arg6[%c0_9, %c0_10] : memref<1x128xf32, #tpu.memory_space<vmem>>, vector<1x128xf32>
    %6 = vector.shape_cast %5 : vector<1x128xf32> to vector<1x128xf32>
    %7 = vector.broadcast %6 : vector<1x128xf32> to vector<8x128xf32>
    %c0_11 = arith.constant 0 : index
    %c0_12 = arith.constant 0 : index
    %8 = vector.load %arg7[%c0_11, %c0_12] : memref<32x16xf32, #tpu.memory_space<vmem>>, vector<32x16xf32>
    %c0_13 = arith.constant 0 : index
    %c0_14 = arith.constant 0 : index
    %9 = vector.load %arg8[%c0_13, %c0_14] : memref<1x16xf32, #tpu.memory_space<vmem>>, vector<1x16xf32>
    %10 = vector.shape_cast %9 : vector<1x16xf32> to vector<1x16xf32>
    %11 = vector.broadcast %10 : vector<1x16xf32> to vector<8x16xf32>
    %c0_15 = arith.constant 0 : index
    %c0_16 = arith.constant 0 : index
    %12 = vector.load %arg0[%c0_15, %c0_16] : memref<64x24xf32, #tpu.memory_space<vmem>>, vector<64x24xf32>
    %cst = arith.constant dense<0.000000e+00> : vector<64x128xf32>
    %13 = tpu.matmul %12, %0, %cst {dimension_numbers = #tpu.dot_dimension_numbers<[1], [0], [0], [1], [0, 0, 1, 1], [], []>} : vector<64x24xf32>, vector<24x128xf32>, vector<64x128xf32> -> vector<64x128xf32>
    %14 = vector.broadcast %1 : vector<1x128xf32> to vector<64x128xf32>
    %15 = arith.addf %13, %14 : vector<64x128xf32>
    %cst_17 = arith.constant 0.000000e+00 : f32
    %16 = vector.broadcast %cst_17 : f32 to vector<8x32xf32>
    %cst_18 = arith.constant 0.000000e+00 : f32
    %17 = vector.broadcast %cst_18 : f32 to vector<8x32xf32>
    %cst_19 = arith.constant 0.000000e+00 : f32
    %18 = vector.broadcast %cst_19 : f32 to vector<8x32xf32>
    %cst_20 = arith.constant 0.000000e+00 : f32
    %19 = vector.broadcast %cst_20 : f32 to vector<8x32xf32>
    %20 = vector.extract_strided_slice %15 {offsets = [0, 0], sizes = [8, 128], strides = [1, 1]} : vector<64x128xf32> to vector<8x128xf32>
    %cst_21 = arith.constant dense<0.000000e+00> : vector<8x128xf32>
    %21 = tpu.matmul %16, %2, %cst_21 {dimension_numbers = #tpu.dot_dimension_numbers<[1], [0], [0], [1], [0, 0, 1, 1], [], []>} : vector<8x32xf32>, vector<32x128xf32>, vector<8x128xf32> -> vector<8x128xf32>
    %22 = arith.addf %20, %21 : vector<8x128xf32>
    %cst_22 = arith.constant 5.000000e-01 : f32
    %23 = vector.broadcast %cst_22 : f32 to vector<8x128xf32>
    %24 = arith.mulf %23, %22 : vector<8x128xf32>
    %25 = math.tanh %24 : vector<8x128xf32>
    %26 = vector.extract_strided_slice %25 {offsets = [0, 0], sizes = [8, 32], strides = [1, 1]} : vector<8x128xf32> to vector<8x32xf32>
    %cst_23 = arith.constant 5.000000e-01 : f32
    %27 = vector.broadcast %cst_23 : f32 to vector<8x32xf32>
    %28 = arith.mulf %27, %26 : vector<8x32xf32>
    %cst_24 = arith.constant 5.000000e-01 : f32
    %29 = vector.broadcast %cst_24 : f32 to vector<8x32xf32>
    %30 = arith.addf %28, %29 : vector<8x32xf32>
    %31 = vector.extract_strided_slice %25 {offsets = [0, 32], sizes = [8, 32], strides = [1, 1]} : vector<8x128xf32> to vector<8x32xf32>
    %cst_25 = arith.constant 5.000000e-01 : f32
    %32 = vector.broadcast %cst_25 : f32 to vector<8x32xf32>
    %33 = arith.mulf %32, %31 : vector<8x32xf32>
    %cst_26 = arith.constant 5.000000e-01 : f32
    %34 = vector.broadcast %cst_26 : f32 to vector<8x32xf32>
    %35 = arith.addf %33, %34 : vector<8x32xf32>
    %36 = vector.extract_strided_slice %25 {offsets = [0, 96], sizes = [8, 32], strides = [1, 1]} : vector<8x128xf32> to vector<8x32xf32>
    %cst_27 = arith.constant 5.000000e-01 : f32
    %37 = vector.broadcast %cst_27 : f32 to vector<8x32xf32>
    %38 = arith.mulf %37, %36 : vector<8x32xf32>
    %cst_28 = arith.constant 5.000000e-01 : f32
    %39 = vector.broadcast %cst_28 : f32 to vector<8x32xf32>
    %40 = arith.addf %38, %39 : vector<8x32xf32>
    %41 = vector.extract_strided_slice %22 {offsets = [0, 64], sizes = [8, 32], strides = [1, 1]} : vector<8x128xf32> to vector<8x32xf32>
    %42 = math.tanh %41 : vector<8x32xf32>
    %43 = arith.mulf %35, %18 : vector<8x32xf32>
    %44 = arith.mulf %30, %42 : vector<8x32xf32>
    %45 = arith.addf %43, %44 : vector<8x32xf32>
    %46 = math.tanh %45 : vector<8x32xf32>
    %47 = arith.mulf %40, %46 : vector<8x32xf32>
    %cst_29 = arith.constant dense<0.000000e+00> : vector<8x128xf32>
    %48 = tpu.matmul %47, %3, %cst_29 {dimension_numbers = #tpu.dot_dimension_numbers<[1], [0], [0], [1], [0, 0, 1, 1], [], []>} : vector<8x32xf32>, vector<32x128xf32>, vector<8x128xf32> -> vector<8x128xf32>
    %cst_30 = arith.constant dense<0.000000e+00> : vector<8x128xf32>
    %49 = tpu.matmul %17, %4, %cst_30 {dimension_numbers = #tpu.dot_dimension_numbers<[1], [0], [0], [1], [0, 0, 1, 1], [], []>} : vector<8x32xf32>, vector<32x128xf32>, vector<8x128xf32> -> vector<8x128xf32>
    %50 = arith.addf %48, %49 : vector<8x128xf32>
    %51 = arith.addf %50, %7 : vector<8x128xf32>
    %cst_31 = arith.constant 5.000000e-01 : f32
    %52 = vector.broadcast %cst_31 : f32 to vector<8x128xf32>
    %53 = arith.mulf %52, %51 : vector<8x128xf32>
    %54 = math.tanh %53 : vector<8x128xf32>
    %55 = vector.extract_strided_slice %54 {offsets = [0, 0], sizes = [8, 32], strides = [1, 1]} : vector<8x128xf32> to vector<8x32xf32>
    %cst_32 = arith.constant 5.000000e-01 : f32
    %56 = vector.broadcast %cst_32 : f32 to vector<8x32xf32>
    %57 = arith.mulf %56, %55 : vector<8x32xf32>
    %cst_33 = arith.constant 5.000000e-01 : f32
    %58 = vector.broadcast %cst_33 : f32 to vector<8x32xf32>
    %59 = arith.addf %57, %58 : vector<8x32xf32>
    %60 = vector.extract_strided_slice %54 {offsets = [0, 32], sizes = [8, 32], strides = [1, 1]} : vector<8x128xf32> to vector<8x32xf32>
    %cst_34 = arith.constant 5.000000e-01 : f32
    %61 = vector.broadcast %cst_34 : f32 to vector<8x32xf32>
    %62 = arith.mulf %61, %60 : vector<8x32xf32>
    %cst_35 = arith.constant 5.000000e-01 : f32
    %63 = vector.broadcast %cst_35 : f32 to vector<8x32xf32>
    %64 = arith.addf %62, %63 : vector<8x32xf32>
    %65 = vector.extract_strided_slice %54 {offsets = [0, 96], sizes = [8, 32], strides = [1, 1]} : vector<8x128xf32> to vector<8x32xf32>
    %cst_36 = arith.constant 5.000000e-01 : f32
    %66 = vector.broadcast %cst_36 : f32 to vector<8x32xf32>
    %67 = arith.mulf %66, %65 : vector<8x32xf32>
    %cst_37 = arith.constant 5.000000e-01 : f32
    %68 = vector.broadcast %cst_37 : f32 to vector<8x32xf32>
    %69 = arith.addf %67, %68 : vector<8x32xf32>
    %70 = vector.extract_strided_slice %51 {offsets = [0, 64], sizes = [8, 32], strides = [1, 1]} : vector<8x128xf32> to vector<8x32xf32>
    %71 = math.tanh %70 : vector<8x32xf32>
    %72 = arith.mulf %64, %19 : vector<8x32xf32>
    %73 = arith.mulf %59, %71 : vector<8x32xf32>
    %74 = arith.addf %72, %73 : vector<8x32xf32>
    %75 = math.tanh %74 : vector<8x32xf32>
    %76 = arith.mulf %69, %75 : vector<8x32xf32>
    %cst_38 = arith.constant dense<0.000000e+00> : vector<8x16xf32>
    %77 = tpu.matmul %76, %8, %cst_38 {dimension_numbers = #tpu.dot_dimension_numbers<[1], [0], [0], [1], [0, 0, 1, 1], [], []>} : vector<8x32xf32>, vector<32x16xf32>, vector<8x16xf32> -> vector<8x16xf32>
    %78 = arith.addf %77, %11 : vector<8x16xf32>
    %79 = vector.extract_strided_slice %15 {offsets = [8, 0], sizes = [8, 128], strides = [1, 1]} : vector<64x128xf32> to vector<8x128xf32>
    %cst_39 = arith.constant dense<0.000000e+00> : vector<8x128xf32>
    %80 = tpu.matmul %47, %2, %cst_39 {dimension_numbers = #tpu.dot_dimension_numbers<[1], [0], [0], [1], [0, 0, 1, 1], [], []>} : vector<8x32xf32>, vector<32x128xf32>, vector<8x128xf32> -> vector<8x128xf32>
    %81 = arith.addf %79, %80 : vector<8x128xf32>
    %cst_40 = arith.constant 5.000000e-01 : f32
    %82 = vector.broadcast %cst_40 : f32 to vector<8x128xf32>
    %83 = arith.mulf %82, %81 : vector<8x128xf32>
    %84 = math.tanh %83 : vector<8x128xf32>
    %85 = vector.extract_strided_slice %84 {offsets = [0, 0], sizes = [8, 32], strides = [1, 1]} : vector<8x128xf32> to vector<8x32xf32>
    %cst_41 = arith.constant 5.000000e-01 : f32
    %86 = vector.broadcast %cst_41 : f32 to vector<8x32xf32>
    %87 = arith.mulf %86, %85 : vector<8x32xf32>
    %cst_42 = arith.constant 5.000000e-01 : f32
    %88 = vector.broadcast %cst_42 : f32 to vector<8x32xf32>
    %89 = arith.addf %87, %88 : vector<8x32xf32>
    %90 = vector.extract_strided_slice %84 {offsets = [0, 32], sizes = [8, 32], strides = [1, 1]} : vector<8x128xf32> to vector<8x32xf32>
    %cst_43 = arith.constant 5.000000e-01 : f32
    %91 = vector.broadcast %cst_43 : f32 to vector<8x32xf32>
    %92 = arith.mulf %91, %90 : vector<8x32xf32>
    %cst_44 = arith.constant 5.000000e-01 : f32
    %93 = vector.broadcast %cst_44 : f32 to vector<8x32xf32>
    %94 = arith.addf %92, %93 : vector<8x32xf32>
    %95 = vector.extract_strided_slice %84 {offsets = [0, 96], sizes = [8, 32], strides = [1, 1]} : vector<8x128xf32> to vector<8x32xf32>
    %cst_45 = arith.constant 5.000000e-01 : f32
    %96 = vector.broadcast %cst_45 : f32 to vector<8x32xf32>
    %97 = arith.mulf %96, %95 : vector<8x32xf32>
    %cst_46 = arith.constant 5.000000e-01 : f32
    %98 = vector.broadcast %cst_46 : f32 to vector<8x32xf32>
    %99 = arith.addf %97, %98 : vector<8x32xf32>
    %100 = vector.extract_strided_slice %81 {offsets = [0, 64], sizes = [8, 32], strides = [1, 1]} : vector<8x128xf32> to vector<8x32xf32>
    %101 = math.tanh %100 : vector<8x32xf32>
    %102 = arith.mulf %94, %45 : vector<8x32xf32>
    %103 = arith.mulf %89, %101 : vector<8x32xf32>
    %104 = arith.addf %102, %103 : vector<8x32xf32>
    %105 = math.tanh %104 : vector<8x32xf32>
    %106 = arith.mulf %99, %105 : vector<8x32xf32>
    %cst_47 = arith.constant dense<0.000000e+00> : vector<8x128xf32>
    %107 = tpu.matmul %106, %3, %cst_47 {dimension_numbers = #tpu.dot_dimension_numbers<[1], [0], [0], [1], [0, 0, 1, 1], [], []>} : vector<8x32xf32>, vector<32x128xf32>, vector<8x128xf32> -> vector<8x128xf32>
    %cst_48 = arith.constant dense<0.000000e+00> : vector<8x128xf32>
    %108 = tpu.matmul %76, %4, %cst_48 {dimension_numbers = #tpu.dot_dimension_numbers<[1], [0], [0], [1], [0, 0, 1, 1], [], []>} : vector<8x32xf32>, vector<32x128xf32>, vector<8x128xf32> -> vector<8x128xf32>
    %109 = arith.addf %107, %108 : vector<8x128xf32>
    %110 = arith.addf %109, %7 : vector<8x128xf32>
    %cst_49 = arith.constant 5.000000e-01 : f32
    %111 = vector.broadcast %cst_49 : f32 to vector<8x128xf32>
    %112 = arith.mulf %111, %110 : vector<8x128xf32>
    %113 = math.tanh %112 : vector<8x128xf32>
    %114 = vector.extract_strided_slice %113 {offsets = [0, 0], sizes = [8, 32], strides = [1, 1]} : vector<8x128xf32> to vector<8x32xf32>
    %cst_50 = arith.constant 5.000000e-01 : f32
    %115 = vector.broadcast %cst_50 : f32 to vector<8x32xf32>
    %116 = arith.mulf %115, %114 : vector<8x32xf32>
    %cst_51 = arith.constant 5.000000e-01 : f32
    %117 = vector.broadcast %cst_51 : f32 to vector<8x32xf32>
    %118 = arith.addf %116, %117 : vector<8x32xf32>
    %119 = vector.extract_strided_slice %113 {offsets = [0, 32], sizes = [8, 32], strides = [1, 1]} : vector<8x128xf32> to vector<8x32xf32>
    %cst_52 = arith.constant 5.000000e-01 : f32
    %120 = vector.broadcast %cst_52 : f32 to vector<8x32xf32>
    %121 = arith.mulf %120, %119 : vector<8x32xf32>
    %cst_53 = arith.constant 5.000000e-01 : f32
    %122 = vector.broadcast %cst_53 : f32 to vector<8x32xf32>
    %123 = arith.addf %121, %122 : vector<8x32xf32>
    %124 = vector.extract_strided_slice %113 {offsets = [0, 96], sizes = [8, 32], strides = [1, 1]} : vector<8x128xf32> to vector<8x32xf32>
    %cst_54 = arith.constant 5.000000e-01 : f32
    %125 = vector.broadcast %cst_54 : f32 to vector<8x32xf32>
    %126 = arith.mulf %125, %124 : vector<8x32xf32>
    %cst_55 = arith.constant 5.000000e-01 : f32
    %127 = vector.broadcast %cst_55 : f32 to vector<8x32xf32>
    %128 = arith.addf %126, %127 : vector<8x32xf32>
    %129 = vector.extract_strided_slice %110 {offsets = [0, 64], sizes = [8, 32], strides = [1, 1]} : vector<8x128xf32> to vector<8x32xf32>
    %130 = math.tanh %129 : vector<8x32xf32>
    %131 = arith.mulf %123, %74 : vector<8x32xf32>
    %132 = arith.mulf %118, %130 : vector<8x32xf32>
    %133 = arith.addf %131, %132 : vector<8x32xf32>
    %134 = math.tanh %133 : vector<8x32xf32>
    %135 = arith.mulf %128, %134 : vector<8x32xf32>
    %cst_56 = arith.constant dense<0.000000e+00> : vector<8x16xf32>
    %136 = tpu.matmul %135, %8, %cst_56 {dimension_numbers = #tpu.dot_dimension_numbers<[1], [0], [0], [1], [0, 0, 1, 1], [], []>} : vector<8x32xf32>, vector<32x16xf32>, vector<8x16xf32> -> vector<8x16xf32>
    %137 = arith.addf %136, %11 : vector<8x16xf32>
    %138 = vector.extract_strided_slice %15 {offsets = [16, 0], sizes = [8, 128], strides = [1, 1]} : vector<64x128xf32> to vector<8x128xf32>
    %cst_57 = arith.constant dense<0.000000e+00> : vector<8x128xf32>
    %139 = tpu.matmul %106, %2, %cst_57 {dimension_numbers = #tpu.dot_dimension_numbers<[1], [0], [0], [1], [0, 0, 1, 1], [], []>} : vector<8x32xf32>, vector<32x128xf32>, vector<8x128xf32> -> vector<8x128xf32>
    %140 = arith.addf %138, %139 : vector<8x128xf32>
    %cst_58 = arith.constant 5.000000e-01 : f32
    %141 = vector.broadcast %cst_58 : f32 to vector<8x128xf32>
    %142 = arith.mulf %141, %140 : vector<8x128xf32>
    %143 = math.tanh %142 : vector<8x128xf32>
    %144 = vector.extract_strided_slice %143 {offsets = [0, 0], sizes = [8, 32], strides = [1, 1]} : vector<8x128xf32> to vector<8x32xf32>
    %cst_59 = arith.constant 5.000000e-01 : f32
    %145 = vector.broadcast %cst_59 : f32 to vector<8x32xf32>
    %146 = arith.mulf %145, %144 : vector<8x32xf32>
    %cst_60 = arith.constant 5.000000e-01 : f32
    %147 = vector.broadcast %cst_60 : f32 to vector<8x32xf32>
    %148 = arith.addf %146, %147 : vector<8x32xf32>
    %149 = vector.extract_strided_slice %143 {offsets = [0, 32], sizes = [8, 32], strides = [1, 1]} : vector<8x128xf32> to vector<8x32xf32>
    %cst_61 = arith.constant 5.000000e-01 : f32
    %150 = vector.broadcast %cst_61 : f32 to vector<8x32xf32>
    %151 = arith.mulf %150, %149 : vector<8x32xf32>
    %cst_62 = arith.constant 5.000000e-01 : f32
    %152 = vector.broadcast %cst_62 : f32 to vector<8x32xf32>
    %153 = arith.addf %151, %152 : vector<8x32xf32>
    %154 = vector.extract_strided_slice %143 {offsets = [0, 96], sizes = [8, 32], strides = [1, 1]} : vector<8x128xf32> to vector<8x32xf32>
    %cst_63 = arith.constant 5.000000e-01 : f32
    %155 = vector.broadcast %cst_63 : f32 to vector<8x32xf32>
    %156 = arith.mulf %155, %154 : vector<8x32xf32>
    %cst_64 = arith.constant 5.000000e-01 : f32
    %157 = vector.broadcast %cst_64 : f32 to vector<8x32xf32>
    %158 = arith.addf %156, %157 : vector<8x32xf32>
    %159 = vector.extract_strided_slice %140 {offsets = [0, 64], sizes = [8, 32], strides = [1, 1]} : vector<8x128xf32> to vector<8x32xf32>
    %160 = math.tanh %159 : vector<8x32xf32>
    %161 = arith.mulf %153, %104 : vector<8x32xf32>
    %162 = arith.mulf %148, %160 : vector<8x32xf32>
    %163 = arith.addf %161, %162 : vector<8x32xf32>
    %164 = math.tanh %163 : vector<8x32xf32>
    %165 = arith.mulf %158, %164 : vector<8x32xf32>
    %cst_65 = arith.constant dense<0.000000e+00> : vector<8x128xf32>
    %166 = tpu.matmul %165, %3, %cst_65 {dimension_numbers = #tpu.dot_dimension_numbers<[1], [0], [0], [1], [0, 0, 1, 1], [], []>} : vector<8x32xf32>, vector<32x128xf32>, vector<8x128xf32> -> vector<8x128xf32>
    %cst_66 = arith.constant dense<0.000000e+00> : vector<8x128xf32>
    %167 = tpu.matmul %135, %4, %cst_66 {dimension_numbers = #tpu.dot_dimension_numbers<[1], [0], [0], [1], [0, 0, 1, 1], [], []>} : vector<8x32xf32>, vector<32x128xf32>, vector<8x128xf32> -> vector<8x128xf32>
    %168 = arith.addf %166, %167 : vector<8x128xf32>
    %169 = arith.addf %168, %7 : vector<8x128xf32>
    %cst_67 = arith.constant 5.000000e-01 : f32
    %170 = vector.broadcast %cst_67 : f32 to vector<8x128xf32>
    %171 = arith.mulf %170, %169 : vector<8x128xf32>
    %172 = math.tanh %171 : vector<8x128xf32>
    %173 = vector.extract_strided_slice %172 {offsets = [0, 0], sizes = [8, 32], strides = [1, 1]} : vector<8x128xf32> to vector<8x32xf32>
    %cst_68 = arith.constant 5.000000e-01 : f32
    %174 = vector.broadcast %cst_68 : f32 to vector<8x32xf32>
    %175 = arith.mulf %174, %173 : vector<8x32xf32>
    %cst_69 = arith.constant 5.000000e-01 : f32
    %176 = vector.broadcast %cst_69 : f32 to vector<8x32xf32>
    %177 = arith.addf %175, %176 : vector<8x32xf32>
    %178 = vector.extract_strided_slice %172 {offsets = [0, 32], sizes = [8, 32], strides = [1, 1]} : vector<8x128xf32> to vector<8x32xf32>
    %cst_70 = arith.constant 5.000000e-01 : f32
    %179 = vector.broadcast %cst_70 : f32 to vector<8x32xf32>
    %180 = arith.mulf %179, %178 : vector<8x32xf32>
    %cst_71 = arith.constant 5.000000e-01 : f32
    %181 = vector.broadcast %cst_71 : f32 to vector<8x32xf32>
    %182 = arith.addf %180, %181 : vector<8x32xf32>
    %183 = vector.extract_strided_slice %172 {offsets = [0, 96], sizes = [8, 32], strides = [1, 1]} : vector<8x128xf32> to vector<8x32xf32>
    %cst_72 = arith.constant 5.000000e-01 : f32
    %184 = vector.broadcast %cst_72 : f32 to vector<8x32xf32>
    %185 = arith.mulf %184, %183 : vector<8x32xf32>
    %cst_73 = arith.constant 5.000000e-01 : f32
    %186 = vector.broadcast %cst_73 : f32 to vector<8x32xf32>
    %187 = arith.addf %185, %186 : vector<8x32xf32>
    %188 = vector.extract_strided_slice %169 {offsets = [0, 64], sizes = [8, 32], strides = [1, 1]} : vector<8x128xf32> to vector<8x32xf32>
    %189 = math.tanh %188 : vector<8x32xf32>
    %190 = arith.mulf %182, %133 : vector<8x32xf32>
    %191 = arith.mulf %177, %189 : vector<8x32xf32>
    %192 = arith.addf %190, %191 : vector<8x32xf32>
    %193 = math.tanh %192 : vector<8x32xf32>
    %194 = arith.mulf %187, %193 : vector<8x32xf32>
    %cst_74 = arith.constant dense<0.000000e+00> : vector<8x16xf32>
    %195 = tpu.matmul %194, %8, %cst_74 {dimension_numbers = #tpu.dot_dimension_numbers<[1], [0], [0], [1], [0, 0, 1, 1], [], []>} : vector<8x32xf32>, vector<32x16xf32>, vector<8x16xf32> -> vector<8x16xf32>
    %196 = arith.addf %195, %11 : vector<8x16xf32>
    %197 = vector.extract_strided_slice %15 {offsets = [24, 0], sizes = [8, 128], strides = [1, 1]} : vector<64x128xf32> to vector<8x128xf32>
    %cst_75 = arith.constant dense<0.000000e+00> : vector<8x128xf32>
    %198 = tpu.matmul %165, %2, %cst_75 {dimension_numbers = #tpu.dot_dimension_numbers<[1], [0], [0], [1], [0, 0, 1, 1], [], []>} : vector<8x32xf32>, vector<32x128xf32>, vector<8x128xf32> -> vector<8x128xf32>
    %199 = arith.addf %197, %198 : vector<8x128xf32>
    %cst_76 = arith.constant 5.000000e-01 : f32
    %200 = vector.broadcast %cst_76 : f32 to vector<8x128xf32>
    %201 = arith.mulf %200, %199 : vector<8x128xf32>
    %202 = math.tanh %201 : vector<8x128xf32>
    %203 = vector.extract_strided_slice %202 {offsets = [0, 0], sizes = [8, 32], strides = [1, 1]} : vector<8x128xf32> to vector<8x32xf32>
    %cst_77 = arith.constant 5.000000e-01 : f32
    %204 = vector.broadcast %cst_77 : f32 to vector<8x32xf32>
    %205 = arith.mulf %204, %203 : vector<8x32xf32>
    %cst_78 = arith.constant 5.000000e-01 : f32
    %206 = vector.broadcast %cst_78 : f32 to vector<8x32xf32>
    %207 = arith.addf %205, %206 : vector<8x32xf32>
    %208 = vector.extract_strided_slice %202 {offsets = [0, 32], sizes = [8, 32], strides = [1, 1]} : vector<8x128xf32> to vector<8x32xf32>
    %cst_79 = arith.constant 5.000000e-01 : f32
    %209 = vector.broadcast %cst_79 : f32 to vector<8x32xf32>
    %210 = arith.mulf %209, %208 : vector<8x32xf32>
    %cst_80 = arith.constant 5.000000e-01 : f32
    %211 = vector.broadcast %cst_80 : f32 to vector<8x32xf32>
    %212 = arith.addf %210, %211 : vector<8x32xf32>
    %213 = vector.extract_strided_slice %202 {offsets = [0, 96], sizes = [8, 32], strides = [1, 1]} : vector<8x128xf32> to vector<8x32xf32>
    %cst_81 = arith.constant 5.000000e-01 : f32
    %214 = vector.broadcast %cst_81 : f32 to vector<8x32xf32>
    %215 = arith.mulf %214, %213 : vector<8x32xf32>
    %cst_82 = arith.constant 5.000000e-01 : f32
    %216 = vector.broadcast %cst_82 : f32 to vector<8x32xf32>
    %217 = arith.addf %215, %216 : vector<8x32xf32>
    %218 = vector.extract_strided_slice %199 {offsets = [0, 64], sizes = [8, 32], strides = [1, 1]} : vector<8x128xf32> to vector<8x32xf32>
    %219 = math.tanh %218 : vector<8x32xf32>
    %220 = arith.mulf %212, %163 : vector<8x32xf32>
    %221 = arith.mulf %207, %219 : vector<8x32xf32>
    %222 = arith.addf %220, %221 : vector<8x32xf32>
    %223 = math.tanh %222 : vector<8x32xf32>
    %224 = arith.mulf %217, %223 : vector<8x32xf32>
    %cst_83 = arith.constant dense<0.000000e+00> : vector<8x128xf32>
    %225 = tpu.matmul %224, %3, %cst_83 {dimension_numbers = #tpu.dot_dimension_numbers<[1], [0], [0], [1], [0, 0, 1, 1], [], []>} : vector<8x32xf32>, vector<32x128xf32>, vector<8x128xf32> -> vector<8x128xf32>
    %cst_84 = arith.constant dense<0.000000e+00> : vector<8x128xf32>
    %226 = tpu.matmul %194, %4, %cst_84 {dimension_numbers = #tpu.dot_dimension_numbers<[1], [0], [0], [1], [0, 0, 1, 1], [], []>} : vector<8x32xf32>, vector<32x128xf32>, vector<8x128xf32> -> vector<8x128xf32>
    %227 = arith.addf %225, %226 : vector<8x128xf32>
    %228 = arith.addf %227, %7 : vector<8x128xf32>
    %cst_85 = arith.constant 5.000000e-01 : f32
    %229 = vector.broadcast %cst_85 : f32 to vector<8x128xf32>
    %230 = arith.mulf %229, %228 : vector<8x128xf32>
    %231 = math.tanh %230 : vector<8x128xf32>
    %232 = vector.extract_strided_slice %231 {offsets = [0, 0], sizes = [8, 32], strides = [1, 1]} : vector<8x128xf32> to vector<8x32xf32>
    %cst_86 = arith.constant 5.000000e-01 : f32
    %233 = vector.broadcast %cst_86 : f32 to vector<8x32xf32>
    %234 = arith.mulf %233, %232 : vector<8x32xf32>
    %cst_87 = arith.constant 5.000000e-01 : f32
    %235 = vector.broadcast %cst_87 : f32 to vector<8x32xf32>
    %236 = arith.addf %234, %235 : vector<8x32xf32>
    %237 = vector.extract_strided_slice %231 {offsets = [0, 32], sizes = [8, 32], strides = [1, 1]} : vector<8x128xf32> to vector<8x32xf32>
    %cst_88 = arith.constant 5.000000e-01 : f32
    %238 = vector.broadcast %cst_88 : f32 to vector<8x32xf32>
    %239 = arith.mulf %238, %237 : vector<8x32xf32>
    %cst_89 = arith.constant 5.000000e-01 : f32
    %240 = vector.broadcast %cst_89 : f32 to vector<8x32xf32>
    %241 = arith.addf %239, %240 : vector<8x32xf32>
    %242 = vector.extract_strided_slice %231 {offsets = [0, 96], sizes = [8, 32], strides = [1, 1]} : vector<8x128xf32> to vector<8x32xf32>
    %cst_90 = arith.constant 5.000000e-01 : f32
    %243 = vector.broadcast %cst_90 : f32 to vector<8x32xf32>
    %244 = arith.mulf %243, %242 : vector<8x32xf32>
    %cst_91 = arith.constant 5.000000e-01 : f32
    %245 = vector.broadcast %cst_91 : f32 to vector<8x32xf32>
    %246 = arith.addf %244, %245 : vector<8x32xf32>
    %247 = vector.extract_strided_slice %228 {offsets = [0, 64], sizes = [8, 32], strides = [1, 1]} : vector<8x128xf32> to vector<8x32xf32>
    %248 = math.tanh %247 : vector<8x32xf32>
    %249 = arith.mulf %241, %192 : vector<8x32xf32>
    %250 = arith.mulf %236, %248 : vector<8x32xf32>
    %251 = arith.addf %249, %250 : vector<8x32xf32>
    %252 = math.tanh %251 : vector<8x32xf32>
    %253 = arith.mulf %246, %252 : vector<8x32xf32>
    %cst_92 = arith.constant dense<0.000000e+00> : vector<8x16xf32>
    %254 = tpu.matmul %253, %8, %cst_92 {dimension_numbers = #tpu.dot_dimension_numbers<[1], [0], [0], [1], [0, 0, 1, 1], [], []>} : vector<8x32xf32>, vector<32x16xf32>, vector<8x16xf32> -> vector<8x16xf32>
    %255 = arith.addf %254, %11 : vector<8x16xf32>
    %256 = vector.extract_strided_slice %15 {offsets = [32, 0], sizes = [8, 128], strides = [1, 1]} : vector<64x128xf32> to vector<8x128xf32>
    %cst_93 = arith.constant dense<0.000000e+00> : vector<8x128xf32>
    %257 = tpu.matmul %224, %2, %cst_93 {dimension_numbers = #tpu.dot_dimension_numbers<[1], [0], [0], [1], [0, 0, 1, 1], [], []>} : vector<8x32xf32>, vector<32x128xf32>, vector<8x128xf32> -> vector<8x128xf32>
    %258 = arith.addf %256, %257 : vector<8x128xf32>
    %cst_94 = arith.constant 5.000000e-01 : f32
    %259 = vector.broadcast %cst_94 : f32 to vector<8x128xf32>
    %260 = arith.mulf %259, %258 : vector<8x128xf32>
    %261 = math.tanh %260 : vector<8x128xf32>
    %262 = vector.extract_strided_slice %261 {offsets = [0, 0], sizes = [8, 32], strides = [1, 1]} : vector<8x128xf32> to vector<8x32xf32>
    %cst_95 = arith.constant 5.000000e-01 : f32
    %263 = vector.broadcast %cst_95 : f32 to vector<8x32xf32>
    %264 = arith.mulf %263, %262 : vector<8x32xf32>
    %cst_96 = arith.constant 5.000000e-01 : f32
    %265 = vector.broadcast %cst_96 : f32 to vector<8x32xf32>
    %266 = arith.addf %264, %265 : vector<8x32xf32>
    %267 = vector.extract_strided_slice %261 {offsets = [0, 32], sizes = [8, 32], strides = [1, 1]} : vector<8x128xf32> to vector<8x32xf32>
    %cst_97 = arith.constant 5.000000e-01 : f32
    %268 = vector.broadcast %cst_97 : f32 to vector<8x32xf32>
    %269 = arith.mulf %268, %267 : vector<8x32xf32>
    %cst_98 = arith.constant 5.000000e-01 : f32
    %270 = vector.broadcast %cst_98 : f32 to vector<8x32xf32>
    %271 = arith.addf %269, %270 : vector<8x32xf32>
    %272 = vector.extract_strided_slice %261 {offsets = [0, 96], sizes = [8, 32], strides = [1, 1]} : vector<8x128xf32> to vector<8x32xf32>
    %cst_99 = arith.constant 5.000000e-01 : f32
    %273 = vector.broadcast %cst_99 : f32 to vector<8x32xf32>
    %274 = arith.mulf %273, %272 : vector<8x32xf32>
    %cst_100 = arith.constant 5.000000e-01 : f32
    %275 = vector.broadcast %cst_100 : f32 to vector<8x32xf32>
    %276 = arith.addf %274, %275 : vector<8x32xf32>
    %277 = vector.extract_strided_slice %258 {offsets = [0, 64], sizes = [8, 32], strides = [1, 1]} : vector<8x128xf32> to vector<8x32xf32>
    %278 = math.tanh %277 : vector<8x32xf32>
    %279 = arith.mulf %271, %222 : vector<8x32xf32>
    %280 = arith.mulf %266, %278 : vector<8x32xf32>
    %281 = arith.addf %279, %280 : vector<8x32xf32>
    %282 = math.tanh %281 : vector<8x32xf32>
    %283 = arith.mulf %276, %282 : vector<8x32xf32>
    %cst_101 = arith.constant dense<0.000000e+00> : vector<8x128xf32>
    %284 = tpu.matmul %283, %3, %cst_101 {dimension_numbers = #tpu.dot_dimension_numbers<[1], [0], [0], [1], [0, 0, 1, 1], [], []>} : vector<8x32xf32>, vector<32x128xf32>, vector<8x128xf32> -> vector<8x128xf32>
    %cst_102 = arith.constant dense<0.000000e+00> : vector<8x128xf32>
    %285 = tpu.matmul %253, %4, %cst_102 {dimension_numbers = #tpu.dot_dimension_numbers<[1], [0], [0], [1], [0, 0, 1, 1], [], []>} : vector<8x32xf32>, vector<32x128xf32>, vector<8x128xf32> -> vector<8x128xf32>
    %286 = arith.addf %284, %285 : vector<8x128xf32>
    %287 = arith.addf %286, %7 : vector<8x128xf32>
    %cst_103 = arith.constant 5.000000e-01 : f32
    %288 = vector.broadcast %cst_103 : f32 to vector<8x128xf32>
    %289 = arith.mulf %288, %287 : vector<8x128xf32>
    %290 = math.tanh %289 : vector<8x128xf32>
    %291 = vector.extract_strided_slice %290 {offsets = [0, 0], sizes = [8, 32], strides = [1, 1]} : vector<8x128xf32> to vector<8x32xf32>
    %cst_104 = arith.constant 5.000000e-01 : f32
    %292 = vector.broadcast %cst_104 : f32 to vector<8x32xf32>
    %293 = arith.mulf %292, %291 : vector<8x32xf32>
    %cst_105 = arith.constant 5.000000e-01 : f32
    %294 = vector.broadcast %cst_105 : f32 to vector<8x32xf32>
    %295 = arith.addf %293, %294 : vector<8x32xf32>
    %296 = vector.extract_strided_slice %290 {offsets = [0, 32], sizes = [8, 32], strides = [1, 1]} : vector<8x128xf32> to vector<8x32xf32>
    %cst_106 = arith.constant 5.000000e-01 : f32
    %297 = vector.broadcast %cst_106 : f32 to vector<8x32xf32>
    %298 = arith.mulf %297, %296 : vector<8x32xf32>
    %cst_107 = arith.constant 5.000000e-01 : f32
    %299 = vector.broadcast %cst_107 : f32 to vector<8x32xf32>
    %300 = arith.addf %298, %299 : vector<8x32xf32>
    %301 = vector.extract_strided_slice %290 {offsets = [0, 96], sizes = [8, 32], strides = [1, 1]} : vector<8x128xf32> to vector<8x32xf32>
    %cst_108 = arith.constant 5.000000e-01 : f32
    %302 = vector.broadcast %cst_108 : f32 to vector<8x32xf32>
    %303 = arith.mulf %302, %301 : vector<8x32xf32>
    %cst_109 = arith.constant 5.000000e-01 : f32
    %304 = vector.broadcast %cst_109 : f32 to vector<8x32xf32>
    %305 = arith.addf %303, %304 : vector<8x32xf32>
    %306 = vector.extract_strided_slice %287 {offsets = [0, 64], sizes = [8, 32], strides = [1, 1]} : vector<8x128xf32> to vector<8x32xf32>
    %307 = math.tanh %306 : vector<8x32xf32>
    %308 = arith.mulf %300, %251 : vector<8x32xf32>
    %309 = arith.mulf %295, %307 : vector<8x32xf32>
    %310 = arith.addf %308, %309 : vector<8x32xf32>
    %311 = math.tanh %310 : vector<8x32xf32>
    %312 = arith.mulf %305, %311 : vector<8x32xf32>
    %cst_110 = arith.constant dense<0.000000e+00> : vector<8x16xf32>
    %313 = tpu.matmul %312, %8, %cst_110 {dimension_numbers = #tpu.dot_dimension_numbers<[1], [0], [0], [1], [0, 0, 1, 1], [], []>} : vector<8x32xf32>, vector<32x16xf32>, vector<8x16xf32> -> vector<8x16xf32>
    %314 = arith.addf %313, %11 : vector<8x16xf32>
    %315 = vector.extract_strided_slice %15 {offsets = [40, 0], sizes = [8, 128], strides = [1, 1]} : vector<64x128xf32> to vector<8x128xf32>
    %cst_111 = arith.constant dense<0.000000e+00> : vector<8x128xf32>
    %316 = tpu.matmul %283, %2, %cst_111 {dimension_numbers = #tpu.dot_dimension_numbers<[1], [0], [0], [1], [0, 0, 1, 1], [], []>} : vector<8x32xf32>, vector<32x128xf32>, vector<8x128xf32> -> vector<8x128xf32>
    %317 = arith.addf %315, %316 : vector<8x128xf32>
    %cst_112 = arith.constant 5.000000e-01 : f32
    %318 = vector.broadcast %cst_112 : f32 to vector<8x128xf32>
    %319 = arith.mulf %318, %317 : vector<8x128xf32>
    %320 = math.tanh %319 : vector<8x128xf32>
    %321 = vector.extract_strided_slice %320 {offsets = [0, 0], sizes = [8, 32], strides = [1, 1]} : vector<8x128xf32> to vector<8x32xf32>
    %cst_113 = arith.constant 5.000000e-01 : f32
    %322 = vector.broadcast %cst_113 : f32 to vector<8x32xf32>
    %323 = arith.mulf %322, %321 : vector<8x32xf32>
    %cst_114 = arith.constant 5.000000e-01 : f32
    %324 = vector.broadcast %cst_114 : f32 to vector<8x32xf32>
    %325 = arith.addf %323, %324 : vector<8x32xf32>
    %326 = vector.extract_strided_slice %320 {offsets = [0, 32], sizes = [8, 32], strides = [1, 1]} : vector<8x128xf32> to vector<8x32xf32>
    %cst_115 = arith.constant 5.000000e-01 : f32
    %327 = vector.broadcast %cst_115 : f32 to vector<8x32xf32>
    %328 = arith.mulf %327, %326 : vector<8x32xf32>
    %cst_116 = arith.constant 5.000000e-01 : f32
    %329 = vector.broadcast %cst_116 : f32 to vector<8x32xf32>
    %330 = arith.addf %328, %329 : vector<8x32xf32>
    %331 = vector.extract_strided_slice %320 {offsets = [0, 96], sizes = [8, 32], strides = [1, 1]} : vector<8x128xf32> to vector<8x32xf32>
    %cst_117 = arith.constant 5.000000e-01 : f32
    %332 = vector.broadcast %cst_117 : f32 to vector<8x32xf32>
    %333 = arith.mulf %332, %331 : vector<8x32xf32>
    %cst_118 = arith.constant 5.000000e-01 : f32
    %334 = vector.broadcast %cst_118 : f32 to vector<8x32xf32>
    %335 = arith.addf %333, %334 : vector<8x32xf32>
    %336 = vector.extract_strided_slice %317 {offsets = [0, 64], sizes = [8, 32], strides = [1, 1]} : vector<8x128xf32> to vector<8x32xf32>
    %337 = math.tanh %336 : vector<8x32xf32>
    %338 = arith.mulf %330, %281 : vector<8x32xf32>
    %339 = arith.mulf %325, %337 : vector<8x32xf32>
    %340 = arith.addf %338, %339 : vector<8x32xf32>
    %341 = math.tanh %340 : vector<8x32xf32>
    %342 = arith.mulf %335, %341 : vector<8x32xf32>
    %cst_119 = arith.constant dense<0.000000e+00> : vector<8x128xf32>
    %343 = tpu.matmul %342, %3, %cst_119 {dimension_numbers = #tpu.dot_dimension_numbers<[1], [0], [0], [1], [0, 0, 1, 1], [], []>} : vector<8x32xf32>, vector<32x128xf32>, vector<8x128xf32> -> vector<8x128xf32>
    %cst_120 = arith.constant dense<0.000000e+00> : vector<8x128xf32>
    %344 = tpu.matmul %312, %4, %cst_120 {dimension_numbers = #tpu.dot_dimension_numbers<[1], [0], [0], [1], [0, 0, 1, 1], [], []>} : vector<8x32xf32>, vector<32x128xf32>, vector<8x128xf32> -> vector<8x128xf32>
    %345 = arith.addf %343, %344 : vector<8x128xf32>
    %346 = arith.addf %345, %7 : vector<8x128xf32>
    %cst_121 = arith.constant 5.000000e-01 : f32
    %347 = vector.broadcast %cst_121 : f32 to vector<8x128xf32>
    %348 = arith.mulf %347, %346 : vector<8x128xf32>
    %349 = math.tanh %348 : vector<8x128xf32>
    %350 = vector.extract_strided_slice %349 {offsets = [0, 0], sizes = [8, 32], strides = [1, 1]} : vector<8x128xf32> to vector<8x32xf32>
    %cst_122 = arith.constant 5.000000e-01 : f32
    %351 = vector.broadcast %cst_122 : f32 to vector<8x32xf32>
    %352 = arith.mulf %351, %350 : vector<8x32xf32>
    %cst_123 = arith.constant 5.000000e-01 : f32
    %353 = vector.broadcast %cst_123 : f32 to vector<8x32xf32>
    %354 = arith.addf %352, %353 : vector<8x32xf32>
    %355 = vector.extract_strided_slice %349 {offsets = [0, 32], sizes = [8, 32], strides = [1, 1]} : vector<8x128xf32> to vector<8x32xf32>
    %cst_124 = arith.constant 5.000000e-01 : f32
    %356 = vector.broadcast %cst_124 : f32 to vector<8x32xf32>
    %357 = arith.mulf %356, %355 : vector<8x32xf32>
    %cst_125 = arith.constant 5.000000e-01 : f32
    %358 = vector.broadcast %cst_125 : f32 to vector<8x32xf32>
    %359 = arith.addf %357, %358 : vector<8x32xf32>
    %360 = vector.extract_strided_slice %349 {offsets = [0, 96], sizes = [8, 32], strides = [1, 1]} : vector<8x128xf32> to vector<8x32xf32>
    %cst_126 = arith.constant 5.000000e-01 : f32
    %361 = vector.broadcast %cst_126 : f32 to vector<8x32xf32>
    %362 = arith.mulf %361, %360 : vector<8x32xf32>
    %cst_127 = arith.constant 5.000000e-01 : f32
    %363 = vector.broadcast %cst_127 : f32 to vector<8x32xf32>
    %364 = arith.addf %362, %363 : vector<8x32xf32>
    %365 = vector.extract_strided_slice %346 {offsets = [0, 64], sizes = [8, 32], strides = [1, 1]} : vector<8x128xf32> to vector<8x32xf32>
    %366 = math.tanh %365 : vector<8x32xf32>
    %367 = arith.mulf %359, %310 : vector<8x32xf32>
    %368 = arith.mulf %354, %366 : vector<8x32xf32>
    %369 = arith.addf %367, %368 : vector<8x32xf32>
    %370 = math.tanh %369 : vector<8x32xf32>
    %371 = arith.mulf %364, %370 : vector<8x32xf32>
    %cst_128 = arith.constant dense<0.000000e+00> : vector<8x16xf32>
    %372 = tpu.matmul %371, %8, %cst_128 {dimension_numbers = #tpu.dot_dimension_numbers<[1], [0], [0], [1], [0, 0, 1, 1], [], []>} : vector<8x32xf32>, vector<32x16xf32>, vector<8x16xf32> -> vector<8x16xf32>
    %373 = arith.addf %372, %11 : vector<8x16xf32>
    %374 = vector.extract_strided_slice %15 {offsets = [48, 0], sizes = [8, 128], strides = [1, 1]} : vector<64x128xf32> to vector<8x128xf32>
    %cst_129 = arith.constant dense<0.000000e+00> : vector<8x128xf32>
    %375 = tpu.matmul %342, %2, %cst_129 {dimension_numbers = #tpu.dot_dimension_numbers<[1], [0], [0], [1], [0, 0, 1, 1], [], []>} : vector<8x32xf32>, vector<32x128xf32>, vector<8x128xf32> -> vector<8x128xf32>
    %376 = arith.addf %374, %375 : vector<8x128xf32>
    %cst_130 = arith.constant 5.000000e-01 : f32
    %377 = vector.broadcast %cst_130 : f32 to vector<8x128xf32>
    %378 = arith.mulf %377, %376 : vector<8x128xf32>
    %379 = math.tanh %378 : vector<8x128xf32>
    %380 = vector.extract_strided_slice %379 {offsets = [0, 0], sizes = [8, 32], strides = [1, 1]} : vector<8x128xf32> to vector<8x32xf32>
    %cst_131 = arith.constant 5.000000e-01 : f32
    %381 = vector.broadcast %cst_131 : f32 to vector<8x32xf32>
    %382 = arith.mulf %381, %380 : vector<8x32xf32>
    %cst_132 = arith.constant 5.000000e-01 : f32
    %383 = vector.broadcast %cst_132 : f32 to vector<8x32xf32>
    %384 = arith.addf %382, %383 : vector<8x32xf32>
    %385 = vector.extract_strided_slice %379 {offsets = [0, 32], sizes = [8, 32], strides = [1, 1]} : vector<8x128xf32> to vector<8x32xf32>
    %cst_133 = arith.constant 5.000000e-01 : f32
    %386 = vector.broadcast %cst_133 : f32 to vector<8x32xf32>
    %387 = arith.mulf %386, %385 : vector<8x32xf32>
    %cst_134 = arith.constant 5.000000e-01 : f32
    %388 = vector.broadcast %cst_134 : f32 to vector<8x32xf32>
    %389 = arith.addf %387, %388 : vector<8x32xf32>
    %390 = vector.extract_strided_slice %379 {offsets = [0, 96], sizes = [8, 32], strides = [1, 1]} : vector<8x128xf32> to vector<8x32xf32>
    %cst_135 = arith.constant 5.000000e-01 : f32
    %391 = vector.broadcast %cst_135 : f32 to vector<8x32xf32>
    %392 = arith.mulf %391, %390 : vector<8x32xf32>
    %cst_136 = arith.constant 5.000000e-01 : f32
    %393 = vector.broadcast %cst_136 : f32 to vector<8x32xf32>
    %394 = arith.addf %392, %393 : vector<8x32xf32>
    %395 = vector.extract_strided_slice %376 {offsets = [0, 64], sizes = [8, 32], strides = [1, 1]} : vector<8x128xf32> to vector<8x32xf32>
    %396 = math.tanh %395 : vector<8x32xf32>
    %397 = arith.mulf %389, %340 : vector<8x32xf32>
    %398 = arith.mulf %384, %396 : vector<8x32xf32>
    %399 = arith.addf %397, %398 : vector<8x32xf32>
    %400 = math.tanh %399 : vector<8x32xf32>
    %401 = arith.mulf %394, %400 : vector<8x32xf32>
    %cst_137 = arith.constant dense<0.000000e+00> : vector<8x128xf32>
    %402 = tpu.matmul %401, %3, %cst_137 {dimension_numbers = #tpu.dot_dimension_numbers<[1], [0], [0], [1], [0, 0, 1, 1], [], []>} : vector<8x32xf32>, vector<32x128xf32>, vector<8x128xf32> -> vector<8x128xf32>
    %cst_138 = arith.constant dense<0.000000e+00> : vector<8x128xf32>
    %403 = tpu.matmul %371, %4, %cst_138 {dimension_numbers = #tpu.dot_dimension_numbers<[1], [0], [0], [1], [0, 0, 1, 1], [], []>} : vector<8x32xf32>, vector<32x128xf32>, vector<8x128xf32> -> vector<8x128xf32>
    %404 = arith.addf %402, %403 : vector<8x128xf32>
    %405 = arith.addf %404, %7 : vector<8x128xf32>
    %cst_139 = arith.constant 5.000000e-01 : f32
    %406 = vector.broadcast %cst_139 : f32 to vector<8x128xf32>
    %407 = arith.mulf %406, %405 : vector<8x128xf32>
    %408 = math.tanh %407 : vector<8x128xf32>
    %409 = vector.extract_strided_slice %408 {offsets = [0, 0], sizes = [8, 32], strides = [1, 1]} : vector<8x128xf32> to vector<8x32xf32>
    %cst_140 = arith.constant 5.000000e-01 : f32
    %410 = vector.broadcast %cst_140 : f32 to vector<8x32xf32>
    %411 = arith.mulf %410, %409 : vector<8x32xf32>
    %cst_141 = arith.constant 5.000000e-01 : f32
    %412 = vector.broadcast %cst_141 : f32 to vector<8x32xf32>
    %413 = arith.addf %411, %412 : vector<8x32xf32>
    %414 = vector.extract_strided_slice %408 {offsets = [0, 32], sizes = [8, 32], strides = [1, 1]} : vector<8x128xf32> to vector<8x32xf32>
    %cst_142 = arith.constant 5.000000e-01 : f32
    %415 = vector.broadcast %cst_142 : f32 to vector<8x32xf32>
    %416 = arith.mulf %415, %414 : vector<8x32xf32>
    %cst_143 = arith.constant 5.000000e-01 : f32
    %417 = vector.broadcast %cst_143 : f32 to vector<8x32xf32>
    %418 = arith.addf %416, %417 : vector<8x32xf32>
    %419 = vector.extract_strided_slice %408 {offsets = [0, 96], sizes = [8, 32], strides = [1, 1]} : vector<8x128xf32> to vector<8x32xf32>
    %cst_144 = arith.constant 5.000000e-01 : f32
    %420 = vector.broadcast %cst_144 : f32 to vector<8x32xf32>
    %421 = arith.mulf %420, %419 : vector<8x32xf32>
    %cst_145 = arith.constant 5.000000e-01 : f32
    %422 = vector.broadcast %cst_145 : f32 to vector<8x32xf32>
    %423 = arith.addf %421, %422 : vector<8x32xf32>
    %424 = vector.extract_strided_slice %405 {offsets = [0, 64], sizes = [8, 32], strides = [1, 1]} : vector<8x128xf32> to vector<8x32xf32>
    %425 = math.tanh %424 : vector<8x32xf32>
    %426 = arith.mulf %418, %369 : vector<8x32xf32>
    %427 = arith.mulf %413, %425 : vector<8x32xf32>
    %428 = arith.addf %426, %427 : vector<8x32xf32>
    %429 = math.tanh %428 : vector<8x32xf32>
    %430 = arith.mulf %423, %429 : vector<8x32xf32>
    %cst_146 = arith.constant dense<0.000000e+00> : vector<8x16xf32>
    %431 = tpu.matmul %430, %8, %cst_146 {dimension_numbers = #tpu.dot_dimension_numbers<[1], [0], [0], [1], [0, 0, 1, 1], [], []>} : vector<8x32xf32>, vector<32x16xf32>, vector<8x16xf32> -> vector<8x16xf32>
    %432 = arith.addf %431, %11 : vector<8x16xf32>
    %433 = vector.extract_strided_slice %15 {offsets = [56, 0], sizes = [8, 128], strides = [1, 1]} : vector<64x128xf32> to vector<8x128xf32>
    %cst_147 = arith.constant dense<0.000000e+00> : vector<8x128xf32>
    %434 = tpu.matmul %401, %2, %cst_147 {dimension_numbers = #tpu.dot_dimension_numbers<[1], [0], [0], [1], [0, 0, 1, 1], [], []>} : vector<8x32xf32>, vector<32x128xf32>, vector<8x128xf32> -> vector<8x128xf32>
    %435 = arith.addf %433, %434 : vector<8x128xf32>
    %cst_148 = arith.constant 5.000000e-01 : f32
    %436 = vector.broadcast %cst_148 : f32 to vector<8x128xf32>
    %437 = arith.mulf %436, %435 : vector<8x128xf32>
    %438 = math.tanh %437 : vector<8x128xf32>
    %439 = vector.extract_strided_slice %438 {offsets = [0, 0], sizes = [8, 32], strides = [1, 1]} : vector<8x128xf32> to vector<8x32xf32>
    %cst_149 = arith.constant 5.000000e-01 : f32
    %440 = vector.broadcast %cst_149 : f32 to vector<8x32xf32>
    %441 = arith.mulf %440, %439 : vector<8x32xf32>
    %cst_150 = arith.constant 5.000000e-01 : f32
    %442 = vector.broadcast %cst_150 : f32 to vector<8x32xf32>
    %443 = arith.addf %441, %442 : vector<8x32xf32>
    %444 = vector.extract_strided_slice %438 {offsets = [0, 32], sizes = [8, 32], strides = [1, 1]} : vector<8x128xf32> to vector<8x32xf32>
    %cst_151 = arith.constant 5.000000e-01 : f32
    %445 = vector.broadcast %cst_151 : f32 to vector<8x32xf32>
    %446 = arith.mulf %445, %444 : vector<8x32xf32>
    %cst_152 = arith.constant 5.000000e-01 : f32
    %447 = vector.broadcast %cst_152 : f32 to vector<8x32xf32>
    %448 = arith.addf %446, %447 : vector<8x32xf32>
    %449 = vector.extract_strided_slice %438 {offsets = [0, 96], sizes = [8, 32], strides = [1, 1]} : vector<8x128xf32> to vector<8x32xf32>
    %cst_153 = arith.constant 5.000000e-01 : f32
    %450 = vector.broadcast %cst_153 : f32 to vector<8x32xf32>
    %451 = arith.mulf %450, %449 : vector<8x32xf32>
    %cst_154 = arith.constant 5.000000e-01 : f32
    %452 = vector.broadcast %cst_154 : f32 to vector<8x32xf32>
    %453 = arith.addf %451, %452 : vector<8x32xf32>
    %454 = vector.extract_strided_slice %435 {offsets = [0, 64], sizes = [8, 32], strides = [1, 1]} : vector<8x128xf32> to vector<8x32xf32>
    %455 = math.tanh %454 : vector<8x32xf32>
    %456 = arith.mulf %448, %399 : vector<8x32xf32>
    %457 = arith.mulf %443, %455 : vector<8x32xf32>
    %458 = arith.addf %456, %457 : vector<8x32xf32>
    %459 = math.tanh %458 : vector<8x32xf32>
    %460 = arith.mulf %453, %459 : vector<8x32xf32>
    %cst_155 = arith.constant dense<0.000000e+00> : vector<8x128xf32>
    %461 = tpu.matmul %460, %3, %cst_155 {dimension_numbers = #tpu.dot_dimension_numbers<[1], [0], [0], [1], [0, 0, 1, 1], [], []>} : vector<8x32xf32>, vector<32x128xf32>, vector<8x128xf32> -> vector<8x128xf32>
    %cst_156 = arith.constant dense<0.000000e+00> : vector<8x128xf32>
    %462 = tpu.matmul %430, %4, %cst_156 {dimension_numbers = #tpu.dot_dimension_numbers<[1], [0], [0], [1], [0, 0, 1, 1], [], []>} : vector<8x32xf32>, vector<32x128xf32>, vector<8x128xf32> -> vector<8x128xf32>
    %463 = arith.addf %461, %462 : vector<8x128xf32>
    %464 = arith.addf %463, %7 : vector<8x128xf32>
    %cst_157 = arith.constant 5.000000e-01 : f32
    %465 = vector.broadcast %cst_157 : f32 to vector<8x128xf32>
    %466 = arith.mulf %465, %464 : vector<8x128xf32>
    %467 = math.tanh %466 : vector<8x128xf32>
    %468 = vector.extract_strided_slice %467 {offsets = [0, 0], sizes = [8, 32], strides = [1, 1]} : vector<8x128xf32> to vector<8x32xf32>
    %cst_158 = arith.constant 5.000000e-01 : f32
    %469 = vector.broadcast %cst_158 : f32 to vector<8x32xf32>
    %470 = arith.mulf %469, %468 : vector<8x32xf32>
    %cst_159 = arith.constant 5.000000e-01 : f32
    %471 = vector.broadcast %cst_159 : f32 to vector<8x32xf32>
    %472 = arith.addf %470, %471 : vector<8x32xf32>
    %473 = vector.extract_strided_slice %467 {offsets = [0, 32], sizes = [8, 32], strides = [1, 1]} : vector<8x128xf32> to vector<8x32xf32>
    %cst_160 = arith.constant 5.000000e-01 : f32
    %474 = vector.broadcast %cst_160 : f32 to vector<8x32xf32>
    %475 = arith.mulf %474, %473 : vector<8x32xf32>
    %cst_161 = arith.constant 5.000000e-01 : f32
    %476 = vector.broadcast %cst_161 : f32 to vector<8x32xf32>
    %477 = arith.addf %475, %476 : vector<8x32xf32>
    %478 = vector.extract_strided_slice %467 {offsets = [0, 96], sizes = [8, 32], strides = [1, 1]} : vector<8x128xf32> to vector<8x32xf32>
    %cst_162 = arith.constant 5.000000e-01 : f32
    %479 = vector.broadcast %cst_162 : f32 to vector<8x32xf32>
    %480 = arith.mulf %479, %478 : vector<8x32xf32>
    %cst_163 = arith.constant 5.000000e-01 : f32
    %481 = vector.broadcast %cst_163 : f32 to vector<8x32xf32>
    %482 = arith.addf %480, %481 : vector<8x32xf32>
    %483 = vector.extract_strided_slice %464 {offsets = [0, 64], sizes = [8, 32], strides = [1, 1]} : vector<8x128xf32> to vector<8x32xf32>
    %484 = math.tanh %483 : vector<8x32xf32>
    %485 = arith.mulf %477, %428 : vector<8x32xf32>
    %486 = arith.mulf %472, %484 : vector<8x32xf32>
    %487 = arith.addf %485, %486 : vector<8x32xf32>
    %488 = math.tanh %487 : vector<8x32xf32>
    %489 = arith.mulf %482, %488 : vector<8x32xf32>
    %cst_164 = arith.constant dense<0.000000e+00> : vector<8x16xf32>
    %490 = tpu.matmul %489, %8, %cst_164 {dimension_numbers = #tpu.dot_dimension_numbers<[1], [0], [0], [1], [0, 0, 1, 1], [], []>} : vector<8x32xf32>, vector<32x16xf32>, vector<8x16xf32> -> vector<8x16xf32>
    %491 = arith.addf %490, %11 : vector<8x16xf32>
    %492 = tpu.concatenate %78, %137, %196, %255, %314, %373, %432, %491 in 1 : vector<8x16xf32>, vector<8x16xf32>, vector<8x16xf32>, vector<8x16xf32>, vector<8x16xf32>, vector<8x16xf32>, vector<8x16xf32>, vector<8x16xf32> -> vector<8x128xf32>
    %493 = arith.mulf %492, %492 : vector<8x128xf32>
    %cst_165 = arith.constant dense<0.000000e+00> : vector<8xf32>
    %494 = vector.multi_reduction <add>, %493, %cst_165 [1] : vector<8x128xf32> to vector<8xf32>
    %495 = vector.shape_cast %494 : vector<8xf32> to vector<8x1xf32>
    %496 = math.sqrt %495 : vector<8x1xf32>
    %497 = vector.broadcast %496 : vector<8x1xf32> to vector<8x128xf32>
    %498 = arith.divf %492, %497 : vector<8x128xf32>
    %c0_166 = arith.constant 0 : index
    %c0_167 = arith.constant 0 : index
    %499 = vector.load %arg9[%c0_166, %c0_167] : memref<8x128xf32, #tpu.memory_space<vmem>>, vector<8x128xf32>
    tpu.vector_store %arg9[%c0_166, %c0_167], %498 {strides = array<i32>} : memref<8x128xf32, #tpu.memory_space<vmem>>, vector<8x128xf32>,
    return
  }
}

</mosaic_0001>

<bundles_post_ra>
// kernel: speech_embedder.1
= control target key start
LH: loop header
LB: loop body
LE: loop exit
PB: predicated region body
PF: predicated region fallthrough
CT: control target
= control target key end

     0   :  { %vm80_vm0 = vcmask 195584   ;;  %v3850_v2 = vmov 0.0|0.0   ;;  %vm3851_vm1 = vmmov 0   ;;  %v3852_v4 = vmov 0.0   ;;  %s3853_s27 = smov 64   ;;  %s3854_s28 = smov 32   ;;  %s4433_s1 = inlined_call_operand.vmem [shape: f32[24,128], index: 1, kind: input, shape index: {}]   ;;  %s4434_s3 = inlined_call_operand.vmem [shape: f32[32,128], index: 3, kind: input, shape index: {}]   ;;  %s4435_s0 = inlined_call_operand.vmem [shape: f32[64,24], index: 0, kind: input, shape index: {}]   ;;  %s4436_s2 = inlined_call_operand.vmem [shape: f32[1,128], index: 2, kind: input, shape index: {}]   ;;  %s4437_s4 = inlined_call_operand.vmem [shape: f32[32,128], index: 4, kind: input, shape index: {}]   ;;  %s4438_s5 = inlined_call_operand.vmem [shape: f32[32,128], index: 5, kind: input, shape index: {}]   ;;  %s4439_s6 = inlined_call_operand.vmem [shape: f32[1,128], index: 6, kind: input, shape index: {}]   ;;  %s4440_s7 = inlined_call_operand.vmem [shape: f32[32,16], index: 7, kind: input, shape index: {}]   ;;  %s4441_s8 = inlined_call_operand.vmem [shape: f32[1,16], index: 8, kind: input, shape index: {}]   ;;  %s4442_s9 = inlined_call_operand.vmem [shape: f32[8,128], index: 9, kind: output, shape index: {}]  }
   0x1   :  { %v32_v0 = vld [vmem:[%s4433_s1] sm:$0xff]  ;;  %v33_v1 = vld [vmem:[%s4433_s1 + $0x8] sm:$0xff]  ;;  %3546 = vmatprep.subr.bf16.mxu1 %v3850_v2  ;;  %3198 = vmatprep.mubr.msk.f32.mxu1 %vm3851_vm1, %v3852_v4  ;;  %v34_v9 = vld [vmem:[%s4433_s1 + $0x10] sm:$0xff]  ;;  %vm210_vm2 = vcmask 261120   ;;  %s3855_s1 = smov 16   ;;  %s3856_s25 = smov 48  }
   0x2   :  { %v36_v3 = vld [vmem:[%s4434_s3] sm:$0xff]  ;;  %v3542_v5 = vpack.c.bf16 %v33_v1, %v32_v0  ;;  %v37_v6 = vld [vmem:[%s4434_s3 + $0x8] sm:$0xff]  ;;  %v38_v10 = vld [vmem:[%s4434_s3 + $0x10] sm:$0xff]  ;;  %s3859_s26 = smov 112   ;;  %vm2930_vm3 = vcmask 130048   ;;  %vm2933_vm4 = vcmask 392192  }
   0x3   :  { %v66_v7 = vld [vmem:[%s4435_s0] sm:$0xff]  ;;  %v3928_v8 = vpack.c.bf16 %v37_v6, %v36_v3  ;;  %v39_v11 = vld [vmem:[%s4434_s3 + $0x18] sm:$0xff]  ;;  %v67_v13 = vld [vmem:[%s4435_s0 + $0x8] sm:$0xff]  ;;  %s3857_s3 = smov 80   ;;  %vm2935_vm5 = vcmask 523264   ;;  %vm2937_vm6 = vcmask 654336  }
   0x4   :  { %3178 = vmatprep.mubr.msk.f32.mxu0 %vm80_vm0, %v66_v7  ;;  %3543 = vmatprep.subr.bf16.mxu0 %v3542_v5  ;;  %v3941_v12 = vpack.c.bf16 %v39_v11, %v38_v10  ;;  %v3957_v14 = vld [vmem:[%s4436_s2] ss:$0 sm:$0xff]  ;;  %v68_v31 = vld [vmem:[%s4435_s0 + $0x10] sm:$0xff]  ;;  %v69_v32 = vld [vmem:[%s4435_s0 + $0x18] sm:$0xff]  ;;  %vm2939_vm7 = vcmask 785408   ;;  %vm2941_vm8 = vcmask 916480  }
   0x5   :  { %3545 = vmatpush3.bf16.msra.mxu0 %v3542_v5  ;;  %3548 = vmatpush3.bf16.msra.mxu1 %v3928_v8  ;;  %v70_v33 = vld [vmem:[%s4435_s0 + $0x20] sm:$0xff]  ;;  %v41_v35 = vld [vmem:[%s4437_s4 + $0x8] sm:$0xff]  ;;  %v42_v39 = vld [vmem:[%s4437_s4 + $0x10] sm:$0xff] }
   0x6   :  { %3176 = vmatprep.subr.mxu0 %v34_v9  ;;  %3549 = vmatprep.subr.bf16.mxu1 %v3850_v2  ;;  %v40_v34 = vld [vmem:[%s4437_s4] sm:$0xff]  ;;  %v45_v38 = vld [vmem:[%s4438_s5 + $0x8] sm:$0xff]  ;;  %v43_v42 = vld [vmem:[%s4437_s4 + $0x18] sm:$0xff] }
   0x7   :  { %v3983_v36 = vpack.c.bf16 %v41_v35, %v40_v34  ;;  %v44_v37 = vld [vmem:[%s4438_s5] sm:$0xff]  ;;  %v71_v40 = vld [vmem:[%s4435_s0 + $0x28] sm:$0xff]  ;;  %v4005_v43 = vpack.c.bf16 %v43_v42, %v42_v39  ;;  %v72_v44 = vld [vmem:[%s4435_s0 + $0x30] sm:$0xff] }
   0x8   :  { %v3999_v41 = vpack.c.bf16 %v45_v38, %v44_v37  ;;  %v46_v45 = vld [vmem:[%s4438_s5 + $0x10] sm:$0xff]  ;;  %v47_v46 = vld [vmem:[%s4438_s5 + $0x18] sm:$0xff]  ;;  %v4067_v61 = vld [vmem:[%s4439_s6] ss:$0 sm:$0xff] }
   0x9   :  { %3177 = vmatpush3.msra.mxu0 %v34_v9  ;;  %3551 = vmatpush3.bf16.msra.mxu1 %v3941_v12  ;;  %v4018_v47 = vpack.c.bf16 %v47_v46, %v46_v45  ;;  %v73_v48 = vld [vmem:[%s4435_s0 + $0x38] sm:$0xff]  ;;  %v57_v34 = vld [vmem:[%s4440_s7 + $0x10] sm:$0xff] }
   0xa   :  { %3179 = vmatmul.mubr.msk.f32.vlgmr.msra.gmra.mrb[0].mxu0 %vm80_vm0, %v67_v13  ;;  %3558 = vmatprep.subr.bf16.mxu0 %v3850_v2 }
   0xb   :  { %3552 = vmatprep.subr.bf16.mxu1 %v3850_v2  ;;  %3181 = vmatprep.mubr.msk.f32.mxu0 %vm80_vm0, %v68_v31 }
   0xc   :  { %3199 = vmatmul.mubr.f32.vlgmr.msra.gmra.mrb[0].mxu1 %v3852_v4  ;;  %3560 = vmatpush3.bf16.msra.mxu0 %v3983_v36 }
   0xd   :  { %3209 = vmatprep.mubr.msk.f32.mxu1 %vm3851_vm1, %v3852_v4  ;;  %3561 = vmatprep.subr.bf16.mxu0 %v3850_v2 }
   0xe   :  { %3182 = vmatmul.mubr.msk.f32.gmra.mrb[2].mxu0 %vm80_vm0, %v69_v32  ;;  %3554 = vmatpush3.bf16.msra.mxu1 %v3999_v41  ;;  %v55_v32 = vld [vmem:[%s4440_s7] sm:$0xff] }
   0xf   :  { %3184 = vmatprep.mubr.msk.f32.mxu0 %vm80_vm0, %v70_v33  ;;  %3555 = vmatprep.subr.bf16.mxu1 %v3850_v2  ;;  %v56_v33 = vld [vmem:[%s4440_s7 + $0x8] sm:$0xff] }
  0x10   :  { %3563 = vmatpush3.bf16.msra.mxu0 %v4005_v43  ;;  %v4092_v35 = vpack.c.bf16 %v56_v33, %v55_v32 }
  0x11   :  { %3570 = vmatprep.subr.bf16.mxu0 %v3850_v2 }
  0x12   :  { %3185 = vmatmul.mubr.msk.f32.gmra.mrb[4].mxu0 %vm80_vm0, %v71_v40  ;;  %3557 = vmatpush3.bf16.msra.mxu1 %v4018_v47 }
  0x13   :  { %3187 = vmatprep.mubr.msk.f32.mxu0 %vm80_vm0, %v72_v44  ;;  %3564 = vmatprep.subr.bf16.mxu1 %v3850_v2 }
  0x15   :  { %3210 = vmatmul.mubr.f32.vlgmr.msra.gmra.mrb[2].mxu1 %v3852_v4 }
  0x16   :  { %3188 = vmatmul.mubr.msk.f32.gmra.mrb[6].mxu0 %vm80_vm0, %v73_v48  ;;  %3231 = vmatprep.mubr.msk.f32.mxu1 %vm3851_vm1, %v3852_v4 }
  0x17   :  { %3220 = vmatprep.mubr.msk.f32.mxu0 %vm3851_vm1, %v3852_v4  ;;  %3566 = vmatpush3.bf16.msra.mxu1 %v4092_v35 }
  0x18   :  { %3567 = vmatprep.subr.bf16.mxu1 %v3850_v2 }
  0xdd   :  { %v3959_v15 = vpop.f32.mrb[0].mxu0 }
  0xde   :  { %v171_v16 = vpop.f32.mrb[1].mxu0  ;;  %v177_v3 = vadd.f32 %v3959_v15, %v3957_v14 }
  0xdf   :  { %v172_v17 = vadd.f32 %v3957_v14, %v171_v16  ;;  %v280_v18 = vpop.f32.mrb[0].mxu1 }
  0xe0   :  { %v3200_v19 = vpop.f32.mrb[1].mxu1 }
  0xe1   :  { %v284_v20 = vadd.f32 %v280_v18, %v172_v17  ;;  %v4038_v52 = vpop.f32.mrb[2].mxu0 }
  0xe2   :  { %v4040_v53 = vpop.f32.mrb[3].mxu0 }
  0xe3   :  { %3748 = vtanh.f32 %v284_v20  ;;  %v285_v22 = vmul.f32 0.5, %v284_v20 }
  0xe5   :  { %3750 = vtanh.f32 %v285_v22  ;;  %v4042_v54 = vpop.f32.mrb[4].mxu0 }
  0xe6   :  { %v4044_v55 = vpop.f32.mrb[5].mxu0 }
  0xe8   :  { %v373_v58 = vpop.f32.mrb[2].mxu1 }
  0xe9   :  { %v4046_v56 = vpop.f32.mrb[6].mxu0  ;;  %v3211_v59 = vpop.f32.mrb[3].mxu1 }
  0xea   :  { %v4048_v57 = vpop.f32.mrb[7].mxu0 }
  0xed   :  { %v3749_v21 = vpop.eup %3748 }
  0xee   :  { %292 = vrot.lane.b32.xlu0 %v3749_v21, %s3853_s27 }
  0xef   :  { %v3751_v23 = vpop.eup %3750 }
  0xf0   :  { %v287_v24 = vmul.f32 0.5, %v3751_v23 }
  0xf2   :  { %v288_v25 = vadd.f32 0.5, %v287_v24 }
  0xf4   :  { %v290_v28 = vmul.f32 0.0, %v288_v25 }
 0x160   :  { %v293_v26 = vpop.permute.xlu0 %292 }
 0x161   :  { %v295_v27 = vmul.f32 %v293_v26, %v288_v25 }
 0x163   :  { %297 = vrot.lane.b32.xlu0 %v295_v27, %s3854_s28 }
 0x1d5   :  { %v298_v29 = vpop.permute.xlu0 %297 }
 0x1d6   :  { %v3964_v30 = vadd.f32 %v298_v29, %v290_v28 }
 0x1d8   :  { %3752 = vtanh.f32 %v3964_v30 }
 0x1e2   :  { %v3753_v49 = vpop.eup %3752 }
 0x1e3   :  { %303 = vrot.lane.b32.xlu1 %v3753_v49, %s3853_s27 }
 0x255   :  { %v304_v50 = vpop.permute.xlu1 %303 }
 0x256   :  { %v306_v51 = vmul.f32 %v304_v50, %v288_v25 }
 0x258   :  { %378 = vrot.lane.b32.xlu1 %v306_v51, %s3854_s28 }
 0x2ca   :  { %v379_v60 = vpop.permute.xlu1 %378 }
 0x2cb   :  { %3221 = vmatmul.mubr.msk.f32.vlgmr.msra.gmra.mrb[8].mxu0 %vm210_vm2, %v379_v60 }
 0x2cc   :  { %3572 = vmatpush3.bf16.msra.mxu0 %v3928_v8  ;;  %3242 = vmatprep.mubr.msk.f32.mxu0 %vm3851_vm1, %v3852_v4 }
 0x2cd   :  { %3573 = vmatprep.subr.bf16.mxu0 %v3850_v2 }
 0x2d0   :  { %3575 = vmatpush3.bf16.msra.mxu0 %v3941_v12 }
 0x2d1   :  { %3582 = vmatprep.subr.bf16.mxu0 %v3850_v2 }
 0x2d3   :  { %3243 = vmatmul.mubr.msk.f32.vlgmr.msra.gmra.mrb[10].mxu0 %vm210_vm2, %v379_v60 }
 0x2d4   :  { %3584 = vmatpush3.bf16.msra.mxu0 %v3983_v36  ;;  %3264 = vmatprep.mubr.msk.f32.mxu0 %vm3851_vm1, %v3852_v4 }
 0x2d5   :  { %3585 = vmatprep.subr.bf16.mxu0 %v3850_v2 }
 0x2d8   :  { %3587 = vmatpush3.bf16.msra.mxu0 %v4005_v43 }
 0x2d9   :  { %3594 = vmatprep.subr.bf16.mxu0 %v3850_v2 }
 0x39e   :  { %v448_v62 = vpop.f32.mrb[8].mxu0 }
 0x39f   :  { %v449_v63 = vadd.f32 %v448_v62, %v373_v58  ;;  %v3222_v0 = vpop.f32.mrb[9].mxu0 }
 0x3a0   :  { %v182_v0 = vadd.f32 %v3957_v14, %v4040_v53 }
 0x3a1   :  { %v452_v1 = vadd.f32 %v4067_v61, %v449_v63 }
 0x3a3   :  { %3754 = vtanh.f32 %v452_v1  ;;  %v453_v11 = vmul.f32 0.5, %v452_v1 }
 0x3a6   :  { %v616_v5 = vpop.f32.mrb[10].mxu0 }
 0x3a7   :  { %v620_v6 = vadd.f32 %v616_v5, %v177_v3  ;;  %v3244_v7 = vpop.f32.mrb[11].mxu0 }
 0x3a9   :  { %3756 = vtanh.f32 %v620_v6  ;;  %v621_v13 = vmul.f32 0.5, %v620_v6 }
 0x3aa   :  { %3758 = vtanh.f32 %v453_v11 }
 0x3ab   :  { %3760 = vtanh.f32 %v621_v13 }
 0x3ad   :  { %v3755_v9 = vpop.eup %3754 }
 0x3ae   :  { %460 = vrot.lane.b32.xlu0 %v3755_v9, %s3853_s27 }
 0x3b3   :  { %v3757_v10 = vpop.eup %3756 }
 0x3b4   :  { %628 = vrot.lane.b32.xlu1 %v3757_v10, %s3853_s27  ;;  %v3759_v16 = vpop.eup %3758 }
 0x3b5   :  { %v455_v17 = vmul.f32 0.5, %v3759_v16  ;;  %v3761_v18 = vpop.eup %3760 }
 0x3b6   :  { %v623_v21 = vmul.f32 0.5, %v3761_v18 }
 0x3b7   :  { %v456_v19 = vadd.f32 0.5, %v455_v17 }
 0x3b8   :  { %v624_v22 = vadd.f32 0.5, %v623_v21 }
 0x3b9   :  { %v458_v25 = vmul.f32 0.0, %v456_v19 }
 0x3ba   :  { %v626_v28 = vmul.f32 %v624_v22, %v3964_v30  ;;  %v58_v30 = vld [vmem:[%s4440_s7 + $0x18] sm:$0xff] }
 0x3bb   :  { %v4098_v38 = vpack.c.bf16 %v58_v30, %v57_v34 }
 0x3bd   :  { %3569 = vmatpush3.bf16.msra.mxu1 %v4098_v38 }
 0x3be   :  { %3576 = vmatprep.subr.bf16.mxu1 %v3850_v2 }
 0x420   :  { %v461_v20 = vpop.permute.xlu0 %460 }
 0x421   :  { %v463_v15 = vmul.f32 %v461_v20, %v456_v19 }
 0x423   :  { %465 = vrot.lane.b32.xlu0 %v463_v15, %s3854_s28 }
 0x426   :  { %v629_v23 = vpop.permute.xlu1 %628 }
 0x427   :  { %v631_v24 = vmul.f32 %v629_v23, %v624_v22 }
 0x429   :  { %633 = vrot.lane.b32.xlu1 %v631_v24, %s3854_s28 }
 0x495   :  { %v466_v26 = vpop.permute.xlu0 %465 }
 0x496   :  { %v4076_v27 = vadd.f32 %v466_v26, %v458_v25 }
 0x498   :  { %3762 = vtanh.f32 %v4076_v27 }
 0x49b   :  { %v634_v29 = vpop.permute.xlu1 %633 }
 0x49c   :  { %v4080_v31 = vadd.f32 %v634_v29, %v626_v28 }
 0x49e   :  { %3764 = vtanh.f32 %v4080_v31 }
 0x4a2   :  { %v3763_v37 = vpop.eup %3762 }
 0x4a3   :  { %471 = vrot.lane.b32.xlu0 %v3763_v37, %s3853_s27 }
 0x4a8   :  { %v3765_v39 = vpop.eup %3764 }
 0x4a9   :  { %639 = vrot.lane.b32.xlu1 %v3765_v39, %s3853_s27 }
 0x515   :  { %v472_v40 = vpop.permute.xlu0 %471 }
 0x516   :  { %v474_v42 = vmul.f32 %v472_v40, %v456_v19 }
 0x518   :  { %476 = vrot.lane.b32.xlu0 %v474_v42, %s3854_s28 }
 0x51b   :  { %v640_v44 = vpop.permute.xlu1 %639 }
 0x51c   :  { %v642_v45 = vmul.f32 %v640_v44, %v624_v22 }
 0x51e   :  { %714 = vrot.lane.b32.xlu1 %v642_v45, %s3854_s28 }
 0x58a   :  { %v477_v46 = vpop.permute.xlu0 %476 }
 0x58b   :  { %3232 = vmatmul.mubr.msk.f32.vlgmr.msra.gmra.mrb[4].mxu1 %vm210_vm2, %v477_v46 }
 0x58c   :  { %3578 = vmatpush3.bf16.msra.mxu1 %v3999_v41  ;;  %3253 = vmatprep.mubr.msk.f32.mxu1 %vm3851_vm1, %v3852_v4 }
 0x58d   :  { %3579 = vmatprep.subr.bf16.mxu1 %v3850_v2 }
 0x590   :  { %3581 = vmatpush3.bf16.msra.mxu1 %v4018_v47  ;;  %v715_v48 = vpop.permute.xlu1 %714 }
 0x591   :  { %3265 = vmatmul.mubr.msk.f32.vlgmr.msra.gmra.mrb[12].mxu0 %vm210_vm2, %v715_v48  ;;  %3588 = vmatprep.subr.bf16.mxu1 %v3850_v2 }
 0x592   :  { %3596 = vmatpush3.bf16.msra.mxu0 %v3928_v8  ;;  %3286 = vmatprep.mubr.msk.f32.mxu0 %vm3851_vm1, %v3852_v4 }
 0x593   :  { %3254 = vmatmul.mubr.msk.f32.vlgmr.msra.gmra.mrb[6].mxu1 %vm210_vm2, %v477_v46  ;;  %3597 = vmatprep.subr.bf16.mxu0 %v3850_v2 }
 0x594   :  { %3590 = vmatpush3.bf16.msra.mxu1 %v4092_v35  ;;  %3275 = vmatprep.mubr.msk.f32.mxu1 %vm3851_vm1, %v3852_v4 }
 0x595   :  { %3591 = vmatprep.subr.bf16.mxu1 %v3850_v2 }
 0x596   :  { %3599 = vmatpush3.bf16.msra.mxu0 %v3941_v12 }
 0x597   :  { %3606 = vmatprep.subr.bf16.mxu0 %v3850_v2 }
 0x598   :  { %3593 = vmatpush3.bf16.msra.mxu1 %v4098_v38 }
 0x599   :  { %3287 = vmatmul.mubr.msk.f32.vlgmr.msra.gmra.mrb[14].mxu0 %vm210_vm2, %v715_v48  ;;  %3600 = vmatprep.subr.bf16.mxu1 %v3850_v2 }
 0x59a   :  { %3608 = vmatpush3.bf16.msra.mxu0 %v3983_v36  ;;  %3308 = vmatprep.mubr.msk.f32.mxu0 %vm3851_vm1, %v3852_v4 }
 0x59b   :  { %3609 = vmatprep.subr.bf16.mxu0 %v3850_v2 }
 0x59e   :  { %3611 = vmatpush3.bf16.msra.mxu0 %v4005_v43 }
 0x59f   :  { %3618 = vmatprep.subr.bf16.mxu0 %v3850_v2 }
 0x65e   :  { %v4135_v49 = vpop.f32.mrb[4].mxu1 }
 0x65f   :  { %v3233_v50 = vpop.f32.mrb[5].mxu1 }
 0x660   :  { %v187_v50 = vadd.f32 %v4038_v52, %v3957_v14 }
 0x664   :  { %v784_v51 = vpop.f32.mrb[12].mxu0 }
 0x665   :  { %v3266_v58 = vpop.f32.mrb[13].mxu0 }
 0x666   :  { %v709_v59 = vpop.f32.mrb[6].mxu1 }
 0x667   :  { %v785_v60 = vadd.f32 %v784_v51, %v709_v59  ;;  %v3255_v62 = vpop.f32.mrb[7].mxu1 }
 0x669   :  { %v788_v63 = vadd.f32 %v4067_v61, %v785_v60 }
 0x66b   :  { %3766 = vtanh.f32 %v788_v63  ;;  %v789_v9 = vmul.f32 0.5, %v788_v63 }
 0x66c   :  { %v952_v1 = vpop.f32.mrb[14].mxu0 }
 0x66d   :  { %v956_v3 = vadd.f32 %v952_v1, %v182_v0  ;;  %v3288_v5 = vpop.f32.mrb[15].mxu0 }
 0x66f   :  { %3768 = vtanh.f32 %v956_v3  ;;  %v957_v10 = vmul.f32 0.5, %v956_v3 }
 0x670   :  { %3770 = vtanh.f32 %v789_v9 }
 0x671   :  { %3772 = vtanh.f32 %v957_v10 }
 0x675   :  { %v3767_v6 = vpop.eup %3766 }
 0x676   :  { %796 = vrot.lane.b32.xlu0 %v3767_v6, %s3853_s27 }
 0x679   :  { %v3769_v7 = vpop.eup %3768 }
 0x67a   :  { %964 = vrot.lane.b32.xlu1 %v3769_v7, %s3853_s27  ;;  %v3771_v11 = vpop.eup %3770 }
 0x67b   :  { %v791_v13 = vmul.f32 0.5, %v3771_v11  ;;  %v3773_v16 = vpop.eup %3772 }
 0x67c   :  { %v959_v53 = vmul.f32 0.5, %v3773_v16 }
 0x67d   :  { %v792_v17 = vadd.f32 0.5, %v791_v13 }
 0x67e   :  { %v960_v20 = vadd.f32 0.5, %v959_v53 }
 0x67f   :  { %v794_v22 = vmul.f32 %v792_v17, %v4076_v27 }
 0x680   :  { %v962_v25 = vmul.f32 %v960_v20, %v4080_v31 }
 0x6e8   :  { %v797_v18 = vpop.permute.xlu0 %796 }
 0x6e9   :  { %v799_v19 = vmul.f32 %v797_v18, %v792_v17 }
 0x6eb   :  { %801 = vrot.lane.b32.xlu0 %v799_v19, %s3854_s28 }
 0x6ec   :  { %v965_v15 = vpop.permute.xlu1 %964 }
 0x6ed   :  { %v967_v21 = vmul.f32 %v965_v15, %v960_v20 }
 0x6ef   :  { %969 = vrot.lane.b32.xlu1 %v967_v21, %s3854_s28 }
 0x75d   :  { %v802_v23 = vpop.permute.xlu0 %801 }
 0x75e   :  { %v4145_v24 = vadd.f32 %v802_v23, %v794_v22 }
 0x760   :  { %3774 = vtanh.f32 %v4145_v24 }
 0x761   :  { %v970_v26 = vpop.permute.xlu1 %969 }
 0x762   :  { %v4149_v28 = vadd.f32 %v970_v26, %v962_v25 }
 0x764   :  { %3776 = vtanh.f32 %v4149_v28 }
 0x76a   :  { %v3775_v29 = vpop.eup %3774 }
 0x76b   :  { %807 = vrot.lane.b32.xlu0 %v3775_v29, %s3853_s27 }
 0x76e   :  { %v3777_v32 = vpop.eup %3776 }
 0x76f   :  { %975 = vrot.lane.b32.xlu1 %v3777_v32, %s3853_s27 }
 0x7dd   :  { %v808_v33 = vpop.permute.xlu0 %807 }
 0x7de   :  { %v810_v27 = vmul.f32 %v808_v33, %v792_v17 }
 0x7e0   :  { %812 = vrot.lane.b32.xlu0 %v810_v27, %s3854_s28 }
 0x7e1   :  { %v976_v34 = vpop.permute.xlu1 %975 }
 0x7e2   :  { %v978_v30 = vmul.f32 %v976_v34, %v960_v20 }
 0x7e4   :  { %1050 = vrot.lane.b32.xlu1 %v978_v30, %s3854_s28 }
 0x852   :  { %v813_v31 = vpop.permute.xlu0 %812 }
 0x853   :  { %3276 = vmatmul.mubr.msk.f32.vlgmr.msra.gmra.mrb[8].mxu1 %vm210_vm2, %v813_v31 }
 0x854   :  { %3602 = vmatpush3.bf16.msra.mxu1 %v3999_v41  ;;  %3297 = vmatprep.mubr.msk.f32.mxu1 %vm3851_vm1, %v3852_v4 }
 0x855   :  { %3603 = vmatprep.subr.bf16.mxu1 %v3850_v2 }
 0x856   :  { %v1051_v37 = vpop.permute.xlu1 %1050 }
 0x857   :  { %3309 = vmatmul.mubr.msk.f32.vlgmr.msra.gmra.mrb[16].mxu0 %vm210_vm2, %v1051_v37 }
 0x858   :  { %3620 = vmatpush3.bf16.msra.mxu0 %v3928_v8  ;;  %3605 = vmatpush3.bf16.msra.mxu1 %v4018_v47 }
 0x859   :  { %3621 = vmatprep.subr.bf16.mxu0 %v3850_v2  ;;  %3330 = vmatprep.mubr.msk.f32.mxu0 %vm3851_vm1, %v3852_v4 }
 0x85a   :  { %3612 = vmatprep.subr.bf16.mxu1 %v3850_v2 }
 0x85b   :  { %3298 = vmatmul.mubr.msk.f32.vlgmr.msra.gmra.mrb[10].mxu1 %vm210_vm2, %v813_v31 }
 0x85c   :  { %3623 = vmatpush3.bf16.msra.mxu0 %v3941_v12  ;;  %3614 = vmatpush3.bf16.msra.mxu1 %v4092_v35 }
 0x85d   :  { %3630 = vmatprep.subr.bf16.mxu0 %v3850_v2  ;;  %3615 = vmatprep.subr.bf16.mxu1 %v3850_v2 }
 0x85e   :  { %3319 = vmatprep.mubr.msk.f32.mxu1 %vm3851_vm1, %v3852_v4 }
 0x85f   :  { %3331 = vmatmul.mubr.msk.f32.vlgmr.msra.gmra.mrb[18].mxu0 %vm210_vm2, %v1051_v37 }
 0x860   :  { %3632 = vmatpush3.bf16.msra.mxu0 %v3983_v36  ;;  %3617 = vmatpush3.bf16.msra.mxu1 %v4098_v38 }
 0x861   :  { %3633 = vmatprep.subr.bf16.mxu0 %v3850_v2  ;;  %3624 = vmatprep.subr.bf16.mxu1 %v3850_v2 }
 0x862   :  { %3352 = vmatprep.mubr.msk.f32.mxu0 %vm3851_vm1, %v3852_v4 }
 0x864   :  { %3635 = vmatpush3.bf16.msra.mxu0 %v4005_v43 }
 0x865   :  { %3642 = vmatprep.subr.bf16.mxu0 %v3850_v2 }
 0x926   :  { %v4184_v39 = vpop.f32.mrb[8].mxu1 }
 0x927   :  { %v3277_v40 = vpop.f32.mrb[9].mxu1 }
 0x928   :  { %v192_v40 = vadd.f32 %v3957_v14, %v4044_v55 }
 0x92a   :  { %v1120_v42 = vpop.f32.mrb[16].mxu0 }
 0x92b   :  { %v3310_v44 = vpop.f32.mrb[17].mxu0 }
 0x92e   :  { %v1045_v45 = vpop.f32.mrb[10].mxu1 }
 0x92f   :  { %v1121_v46 = vadd.f32 %v1120_v42, %v1045_v45  ;;  %v3299_v48 = vpop.f32.mrb[11].mxu1 }
 0x931   :  { %v1124_v51 = vadd.f32 %v4067_v61, %v1121_v46 }
 0x932   :  { %v1288_v58 = vpop.f32.mrb[18].mxu0 }
 0x933   :  { %3778 = vtanh.f32 %v1124_v51  ;;  %v1292_v59 = vadd.f32 %v1288_v58, %v187_v50  ;;  %v3332_v60 = vpop.f32.mrb[19].mxu0  ;;  %v1125_v0 = vmul.f32 0.5, %v1124_v51 }
 0x935   :  { %3780 = vtanh.f32 %v1292_v59  ;;  %v1293_v1 = vmul.f32 0.5, %v1292_v59 }
 0x936   :  { %3782 = vtanh.f32 %v1125_v0 }
 0x937   :  { %3784 = vtanh.f32 %v1293_v1 }
 0x93d   :  { %v3779_v62 = vpop.eup %3778 }
 0x93e   :  { %1132 = vrot.lane.b32.xlu0 %v3779_v62, %s3853_s27 }
 0x93f   :  { %v3781_v63 = vpop.eup %3780 }
 0x940   :  { %1300 = vrot.lane.b32.xlu1 %v3781_v63, %s3853_s27  ;;  %v3783_v3 = vpop.eup %3782 }
 0x941   :  { %v3785_v5 = vpop.eup %3784  ;;  %v1127_v52 = vmul.f32 0.5, %v3783_v3 }
 0x942   :  { %v1295_v6 = vmul.f32 0.5, %v3785_v5 }
 0x943   :  { %v1128_v7 = vadd.f32 0.5, %v1127_v52 }
 0x944   :  { %v1296_v11 = vadd.f32 0.5, %v1295_v6 }
 0x945   :  { %v1130_v17 = vmul.f32 %v1128_v7, %v4145_v24 }
 0x946   :  { %v1298_v19 = vmul.f32 %v1296_v11, %v4149_v28 }
 0x9b0   :  { %v1133_v9 = vpop.permute.xlu0 %1132 }
 0x9b1   :  { %v1135_v10 = vmul.f32 %v1133_v9, %v1128_v7 }
 0x9b2   :  { %v1301_v13 = vpop.permute.xlu1 %1300 }
 0x9b3   :  { %1137 = vrot.lane.b32.xlu0 %v1135_v10, %s3854_s28  ;;  %v1303_v16 = vmul.f32 %v1301_v13, %v1296_v11 }
 0x9b5   :  { %1305 = vrot.lane.b32.xlu1 %v1303_v16, %s3854_s28 }
 0xa25   :  { %v1138_v53 = vpop.permute.xlu0 %1137 }
 0xa26   :  { %v4194_v18 = vadd.f32 %v1138_v53, %v1130_v17 }
 0xa27   :  { %v1306_v20 = vpop.permute.xlu1 %1305 }
 0xa28   :  { %3786 = vtanh.f32 %v4194_v18  ;;  %v4198_v15 = vadd.f32 %v1306_v20, %v1298_v19 }
 0xa2a   :  { %3788 = vtanh.f32 %v4198_v15 }
 0xa32   :  { %v3787_v21 = vpop.eup %3786 }
 0xa33   :  { %1143 = vrot.lane.b32.xlu0 %v3787_v21, %s3853_s27 }
 0xa34   :  { %v3789_v22 = vpop.eup %3788 }
 0xa35   :  { %1311 = vrot.lane.b32.xlu1 %v3789_v22, %s3853_s27 }
 0xaa5   :  { %v1144_v23 = vpop.permute.xlu0 %1143 }
 0xaa6   :  { %v1146_v24 = vmul.f32 %v1144_v23, %v1128_v7 }
 0xaa7   :  { %v1312_v25 = vpop.permute.xlu1 %1311 }
 0xaa8   :  { %1148 = vrot.lane.b32.xlu0 %v1146_v24, %s3854_s28  ;;  %v1314_v26 = vmul.f32 %v1312_v25, %v1296_v11 }
 0xaaa   :  { %1386 = vrot.lane.b32.xlu1 %v1314_v26, %s3854_s28  ;;  %v197_v26 = vadd.f32 %v4042_v54, %v3957_v14 }
 0xb1a   :  { %v1149_v28 = vpop.permute.xlu0 %1148 }
 0xb1b   :  { %3320 = vmatmul.mubr.msk.f32.vlgmr.msra.gmra.mrb[12].mxu1 %vm210_vm2, %v1149_v28 }
 0xb1c   :  { %3626 = vmatpush3.bf16.msra.mxu1 %v3999_v41  ;;  %3341 = vmatprep.mubr.msk.f32.mxu1 %vm3851_vm1, %v3852_v4  ;;  %v1387_v29 = vpop.permute.xlu1 %1386 }
 0xb1d   :  { %3627 = vmatprep.subr.bf16.mxu1 %v3850_v2  ;;  %3353 = vmatmul.mubr.msk.f32.vlgmr.msra.gmra.mrb[20].mxu0 %vm210_vm2, %v1387_v29 }
 0xb1e   :  { %3644 = vmatpush3.bf16.msra.mxu0 %v3928_v8  ;;  %3374 = vmatprep.mubr.msk.f32.mxu0 %vm3851_vm1, %v3852_v4 }
 0xb1f   :  { %3645 = vmatprep.subr.bf16.mxu0 %v3850_v2 }
 0xb20   :  { %3629 = vmatpush3.bf16.msra.mxu1 %v4018_v47 }
 0xb21   :  { %3636 = vmatprep.subr.bf16.mxu1 %v3850_v2 }
 0xb22   :  { %3647 = vmatpush3.bf16.msra.mxu0 %v3941_v12 }
 0xb23   :  { %3342 = vmatmul.mubr.msk.f32.vlgmr.msra.gmra.mrb[14].mxu1 %vm210_vm2, %v1149_v28  ;;  %3654 = vmatprep.subr.bf16.mxu0 %v3850_v2 }
 0xb24   :  { %3638 = vmatpush3.bf16.msra.mxu1 %v4092_v35  ;;  %3363 = vmatprep.mubr.msk.f32.mxu1 %vm3851_vm1, %v3852_v4 }
 0xb25   :  { %3639 = vmatprep.subr.bf16.mxu1 %v3850_v2  ;;  %3375 = vmatmul.mubr.msk.f32.vlgmr.msra.gmra.mrb[22].mxu0 %vm210_vm2, %v1387_v29 }
 0xb26   :  { %3656 = vmatpush3.bf16.msra.mxu0 %v3983_v36  ;;  %3396 = vmatprep.mubr.msk.f32.mxu0 %vm3851_vm1, %v3852_v4 }
 0xb27   :  { %3657 = vmatprep.subr.bf16.mxu0 %v3850_v2 }
 0xb28   :  { %3641 = vmatpush3.bf16.msra.mxu1 %v4098_v38 }
 0xb29   :  { %3648 = vmatprep.subr.bf16.mxu1 %v3850_v2 }
 0xb2a   :  { %3659 = vmatpush3.bf16.msra.mxu0 %v4005_v43 }
 0xb2b   :  { %3666 = vmatprep.subr.bf16.mxu0 %v3850_v2 }
 0xbee   :  { %v4233_v32 = vpop.f32.mrb[12].mxu1 }
 0xbef   :  { %v3321_v33 = vpop.f32.mrb[13].mxu1 }
 0xbf0   :  { %v1456_v27 = vpop.f32.mrb[20].mxu0 }
 0xbf1   :  { %v3354_v34 = vpop.f32.mrb[21].mxu0 }
 0xbf6   :  { %v1381_v30 = vpop.f32.mrb[14].mxu1 }
 0xbf7   :  { %v1457_v31 = vadd.f32 %v1456_v27, %v1381_v30  ;;  %v3343_v37 = vpop.f32.mrb[15].mxu1 }
 0xbf8   :  { %v1624_v44 = vpop.f32.mrb[22].mxu0 }
 0xbf9   :  { %v1460_v42 = vadd.f32 %v4067_v61, %v1457_v31  ;;  %v1628_v45 = vadd.f32 %v1624_v44, %v192_v40  ;;  %v3376_v46 = vpop.f32.mrb[23].mxu0 }
 0xbfb   :  { %3790 = vtanh.f32 %v1460_v42  ;;  %v1461_v51 = vmul.f32 0.5, %v1460_v42  ;;  %v1629_v58 = vmul.f32 0.5, %v1628_v45 }
 0xbfc   :  { %3792 = vtanh.f32 %v1628_v45 }
 0xbfd   :  { %3794 = vtanh.f32 %v1461_v51 }
 0xbfe   :  { %3796 = vtanh.f32 %v1629_v58 }
 0xc05   :  { %v3791_v48 = vpop.eup %3790 }
 0xc06   :  { %v3793_v50 = vpop.eup %3792  ;;  %1468 = vrot.lane.b32.xlu0 %v3791_v48, %s3853_s27 }
 0xc07   :  { %1636 = vrot.lane.b32.xlu1 %v3793_v50, %s3853_s27  ;;  %v3795_v59 = vpop.eup %3794 }
 0xc08   :  { %v3797_v60 = vpop.eup %3796  ;;  %v1463_v55 = vmul.f32 0.5, %v3795_v59 }
 0xc09   :  { %v1631_v62 = vmul.f32 0.5, %v3797_v60 }
 0xc0a   :  { %v1464_v63 = vadd.f32 0.5, %v1463_v55 }
 0xc0b   :  { %v1632_v0 = vadd.f32 0.5, %v1631_v62 }
 0xc0c   :  { %v1466_v6 = vmul.f32 %v1464_v63, %v4194_v18 }
 0xc0d   :  { %v1634_v7 = vmul.f32 %v1632_v0, %v4198_v15 }
 0xc78   :  { %v1469_v1 = vpop.permute.xlu0 %1468 }
 0xc79   :  { %v1637_v3 = vpop.permute.xlu1 %1636  ;;  %v1471_v5 = vmul.f32 %v1469_v1, %v1464_v63 }
 0xc7a   :  { %v1639_v52 = vmul.f32 %v1637_v3, %v1632_v0 }
 0xc7b   :  { %1473 = vrot.lane.b32.xlu0 %v1471_v5, %s3854_s28 }
 0xc7c   :  { %1641 = vrot.lane.b32.xlu1 %v1639_v52, %s3854_s28 }
 0xced   :  { %v1474_v9 = vpop.permute.xlu0 %1473 }
 0xcee   :  { %v1642_v10 = vpop.permute.xlu1 %1641  ;;  %v4244_v11 = vadd.f32 %v1474_v9, %v1466_v6 }
 0xcef   :  { %v4246_v13 = vadd.f32 %v1642_v10, %v1634_v7 }
 0xcf0   :  { %3798 = vtanh.f32 %v4244_v11 }
 0xcf1   :  { %3800 = vtanh.f32 %v4246_v13 }
 0xcfa   :  { %v3799_v16 = vpop.eup %3798 }
 0xcfb   :  { %v3801_v17 = vpop.eup %3800  ;;  %1479 = vrot.lane.b32.xlu0 %v3799_v16, %s3853_s27 }
 0xcfc   :  { %1647 = vrot.lane.b32.xlu1 %v3801_v17, %s3853_s27 }
 0xd6d   :  { %v1480_v53 = vpop.permute.xlu0 %1479 }
 0xd6e   :  { %v1648_v18 = vpop.permute.xlu1 %1647  ;;  %v1482_v19 = vmul.f32 %v1480_v53, %v1464_v63 }
 0xd6f   :  { %v1650_v20 = vmul.f32 %v1648_v18, %v1632_v0 }
 0xd70   :  { %1484 = vrot.lane.b32.xlu0 %v1482_v19, %s3854_s28 }
 0xd71   :  { %1722 = vrot.lane.b32.xlu1 %v1650_v20, %s3854_s28  ;;  %v202_v20 = vadd.f32 %v3957_v14, %v4048_v57 }
 0xde2   :  { %v1485_v15 = vpop.permute.xlu0 %1484 }
 0xde3   :  { %v1723_v21 = vpop.permute.xlu1 %1722  ;;  %3364 = vmatmul.mubr.msk.f32.vlgmr.msra.gmra.mrb[16].mxu1 %vm210_vm2, %v1485_v15 }
 0xde4   :  { %3397 = vmatmul.mubr.msk.f32.vlgmr.msra.gmra.mrb[24].mxu0 %vm210_vm2, %v1723_v21  ;;  %3650 = vmatpush3.bf16.msra.mxu1 %v3999_v41 }
 0xde5   :  { %3668 = vmatpush3.bf16.msra.mxu0 %v3928_v8  ;;  %3651 = vmatprep.subr.bf16.mxu1 %v3850_v2 }
 0xde6   :  { %3669 = vmatprep.subr.bf16.mxu0 %v3850_v2  ;;  %3418 = vmatprep.mubr.msk.f32.mxu0 %vm3851_vm1, %v3852_v4 }
 0xde7   :  { %3385 = vmatprep.mubr.msk.f32.mxu1 %vm3851_vm1, %v3852_v4 }
 0xde8   :  { %3653 = vmatpush3.bf16.msra.mxu1 %v4018_v47 }
 0xde9   :  { %3671 = vmatpush3.bf16.msra.mxu0 %v3941_v12  ;;  %3660 = vmatprep.subr.bf16.mxu1 %v3850_v2 }
 0xdea   :  { %3678 = vmatprep.subr.bf16.mxu0 %v3850_v2 }
 0xdeb   :  { %3386 = vmatmul.mubr.msk.f32.vlgmr.msra.gmra.mrb[18].mxu1 %vm210_vm2, %v1485_v15 }
 0xdec   :  { %3419 = vmatmul.mubr.msk.f32.vlgmr.msra.gmra.mrb[26].mxu0 %vm210_vm2, %v1723_v21  ;;  %3662 = vmatpush3.bf16.msra.mxu1 %v4092_v35 }
 0xded   :  { %3680 = vmatpush3.bf16.msra.mxu0 %v3983_v36  ;;  %3663 = vmatprep.subr.bf16.mxu1 %v3850_v2 }
 0xdee   :  { %3681 = vmatprep.subr.bf16.mxu0 %v3850_v2  ;;  %3440 = vmatprep.mubr.msk.f32.mxu0 %vm3851_vm1, %v3852_v4 }
 0xdef   :  { %3407 = vmatprep.mubr.msk.f32.mxu1 %vm3851_vm1, %v3852_v4 }
 0xdf0   :  { %3665 = vmatpush3.bf16.msra.mxu1 %v4098_v38 }
 0xdf1   :  { %3683 = vmatpush3.bf16.msra.mxu0 %v4005_v43  ;;  %3672 = vmatprep.subr.bf16.mxu1 %v3850_v2 }
 0xdf2   :  { %3690 = vmatprep.subr.bf16.mxu0 %v3850_v2 }
 0xeb6   :  { %v4282_v22 = vpop.f32.mrb[16].mxu1 }
 0xeb7   :  { %v1792_v23 = vpop.f32.mrb[24].mxu0  ;;  %v3365_v24 = vpop.f32.mrb[17].mxu1 }
 0xeb8   :  { %v3398_v25 = vpop.f32.mrb[25].mxu0 }
 0xebe   :  { %v1717_v28 = vpop.f32.mrb[18].mxu1 }
 0xebf   :  { %v1960_v29 = vpop.f32.mrb[26].mxu0  ;;  %v1793_v33 = vadd.f32 %v1792_v23, %v1717_v28  ;;  %v3387_v27 = vpop.f32.mrb[19].mxu1 }
 0xec0   :  { %v1964_v34 = vadd.f32 %v1960_v29, %v197_v26  ;;  %v3420_v30 = vpop.f32.mrb[27].mxu0 }
 0xec1   :  { %v1796_v31 = vadd.f32 %v4067_v61, %v1793_v33 }
 0xec2   :  { %3802 = vtanh.f32 %v1964_v34  ;;  %v1965_v42 = vmul.f32 0.5, %v1964_v34 }
 0xec3   :  { %3804 = vtanh.f32 %v1796_v31  ;;  %v1797_v44 = vmul.f32 0.5, %v1796_v31 }
 0xec4   :  { %3806 = vtanh.f32 %v1965_v42 }
 0xec5   :  { %3808 = vtanh.f32 %v1797_v44 }
 0xecc   :  { %v3803_v37 = vpop.eup %3802 }
 0xecd   :  { %v3805_v40 = vpop.eup %3804  ;;  %1972 = vrot.lane.b32.xlu1 %v3803_v37, %s3853_s27 }
 0xece   :  { %1804 = vrot.lane.b32.xlu0 %v3805_v40, %s3853_s27  ;;  %v3807_v54 = vpop.eup %3806 }
 0xecf   :  { %v3809_v45 = vpop.eup %3808  ;;  %v1967_v46 = vmul.f32 0.5, %v3807_v54 }
 0xed0   :  { %v1799_v48 = vmul.f32 0.5, %v3809_v45 }
 0xed1   :  { %v1968_v50 = vadd.f32 0.5, %v1967_v46 }
 0xed2   :  { %v1800_v58 = vadd.f32 0.5, %v1799_v48 }
 0xed3   :  { %v1970_v62 = vmul.f32 %v1968_v50, %v4246_v13 }
 0xed4   :  { %v1802_v0 = vmul.f32 %v1800_v58, %v4244_v11 }
 0xf3f   :  { %v1973_v51 = vpop.permute.xlu1 %1972 }
 0xf40   :  { %v1975_v59 = vmul.f32 %v1973_v51, %v1968_v50  ;;  %v1805_v60 = vpop.permute.xlu0 %1804 }
 0xf41   :  { %v1807_v55 = vmul.f32 %v1805_v60, %v1800_v58 }
 0xf42   :  { %1977 = vrot.lane.b32.xlu1 %v1975_v59, %s3854_s28 }
 0xf43   :  { %1809 = vrot.lane.b32.xlu0 %v1807_v55, %s3854_s28 }
 0xfb4   :  { %v1978_v63 = vpop.permute.xlu1 %1977 }
 0xfb5   :  { %v4293_v1 = vadd.f32 %v1978_v63, %v1970_v62  ;;  %v1810_v3 = vpop.permute.xlu0 %1809 }
 0xfb6   :  { %v4295_v5 = vadd.f32 %v1810_v3, %v1802_v0 }
 0xfb7   :  { %3810 = vtanh.f32 %v4293_v1 }
 0xfb8   :  { %3812 = vtanh.f32 %v4295_v5 }
 0xfc1   :  { %v3811_v52 = vpop.eup %3810 }
 0xfc2   :  { %v3813_v6 = vpop.eup %3812  ;;  %1983 = vrot.lane.b32.xlu1 %v3811_v52, %s3853_s27 }
 0xfc3   :  { %1815 = vrot.lane.b32.xlu0 %v3813_v6, %s3853_s27  ;;  %v3848_v6 = vld [vmem:[%s4436_s2] ss:$0 sm:$0xff] }
0x1034   :  { %v1984_v7 = vpop.permute.xlu1 %1983 }
0x1035   :  { %v1986_v9 = vmul.f32 %v1984_v7, %v1968_v50  ;;  %v1816_v10 = vpop.permute.xlu0 %1815  ;;  %v207_v7 = vadd.f32 %v3848_v6, %v4046_v56 }
0x1036   :  { %v1818_v13 = vmul.f32 %v1816_v10, %v1800_v58 }
0x1037   :  { %2058 = vrot.lane.b32.xlu1 %v1986_v9, %s3854_s28 }
0x1038   :  { %1820 = vrot.lane.b32.xlu0 %v1818_v13, %s3854_s28 }
0x10a9   :  { %v2059_v11 = vpop.permute.xlu1 %2058 }
0x10aa   :  { %3441 = vmatmul.mubr.msk.f32.vlgmr.msra.gmra.mrb[28].mxu0 %vm210_vm2, %v2059_v11  ;;  %v1821_v16 = vpop.permute.xlu0 %1820 }
0x10ab   :  { %3692 = vmatpush3.bf16.msra.mxu0 %v3928_v8  ;;  %3408 = vmatmul.mubr.msk.f32.vlgmr.msra.gmra.mrb[20].mxu1 %vm210_vm2, %v1821_v16 }
0x10ac   :  { %3674 = vmatpush3.bf16.msra.mxu1 %v3999_v41  ;;  %3693 = vmatprep.subr.bf16.mxu0 %v3850_v2 }
0x10ad   :  { %3675 = vmatprep.subr.bf16.mxu1 %v3850_v2  ;;  %3462 = vmatprep.mubr.msk.f32.mxu0 %vm3851_vm1, %v3852_v4 }
0x10ae   :  { %3429 = vmatprep.mubr.msk.f32.mxu1 %vm3851_vm1, %v3852_v4 }
0x10af   :  { %3695 = vmatpush3.bf16.msra.mxu0 %v3941_v12 }
0x10b0   :  { %3677 = vmatpush3.bf16.msra.mxu1 %v4018_v47  ;;  %3702 = vmatprep.subr.bf16.mxu0 %v3850_v2 }
0x10b1   :  { %3684 = vmatprep.subr.bf16.mxu1 %v3850_v2 }
0x10b2   :  { %3463 = vmatmul.mubr.msk.f32.vlgmr.msra.gmra.mrb[30].mxu0 %vm210_vm2, %v2059_v11 }
0x10b3   :  { %3430 = vmatmul.mubr.msk.f32.vlgmr.msra.gmra.mrb[22].mxu1 %vm210_vm2, %v1821_v16  ;;  %3704 = vmatpush3.bf16.msra.mxu0 %v3983_v36 }
0x10b4   :  { %3705 = vmatprep.subr.bf16.mxu0 %v3850_v2  ;;  %3686 = vmatpush3.bf16.msra.mxu1 %v4092_v35 }
0x10b5   :  { %3484 = vmatprep.mubr.msk.f32.mxu0 %vm3851_vm1, %v3852_v4  ;;  %3687 = vmatprep.subr.bf16.mxu1 %v3850_v2 }
0x10b6   :  { %3451 = vmatprep.mubr.msk.f32.mxu1 %vm3851_vm1, %v3852_v4 }
0x10b7   :  { %3707 = vmatpush3.bf16.msra.mxu0 %v4005_v43 }
0x10b8   :  { %3714 = vmatprep.subr.bf16.mxu0 %v3850_v2  ;;  %3689 = vmatpush3.bf16.msra.mxu1 %v4098_v38 }
0x10b9   :  { %3696 = vmatprep.subr.bf16.mxu1 %v3850_v2 }
0x117d   :  { %v2128_v17 = vpop.f32.mrb[28].mxu0 }
0x117e   :  { %v3442_v53 = vpop.f32.mrb[29].mxu0  ;;  %v4331_v18 = vpop.f32.mrb[20].mxu1 }
0x117f   :  { %v3409_v19 = vpop.f32.mrb[21].mxu1 }
0x1185   :  { %v2296_v15 = vpop.f32.mrb[30].mxu0 }
0x1186   :  { %v2300_v21 = vadd.f32 %v2296_v15, %v202_v20  ;;  %v3464_v23 = vpop.f32.mrb[31].mxu0  ;;  %v2053_v24 = vpop.f32.mrb[22].mxu1 }
0x1187   :  { %v2129_v25 = vadd.f32 %v2128_v17, %v2053_v24  ;;  %v3431_v26 = vpop.f32.mrb[23].mxu1 }
0x1188   :  { %3814 = vtanh.f32 %v2300_v21  ;;  %v2301_v27 = vmul.f32 0.5, %v2300_v21 }
0x1189   :  { %v2132_v28 = vadd.f32 %v4067_v61, %v2129_v25 }
0x118b   :  { %3816 = vtanh.f32 %v2132_v28  ;;  %v2133_v34 = vmul.f32 0.5, %v2132_v28 }
0x118c   :  { %3818 = vtanh.f32 %v2301_v27 }
0x118d   :  { %3820 = vtanh.f32 %v2133_v34 }
0x1192   :  { %v3815_v29 = vpop.eup %3814 }
0x1193   :  { %2308 = vrot.lane.b32.xlu1 %v3815_v29, %s3853_s27 }
0x1195   :  { %v3817_v33 = vpop.eup %3816 }
0x1196   :  { %2140 = vrot.lane.b32.xlu0 %v3817_v33, %s3853_s27  ;;  %v3819_v14 = vpop.eup %3818 }
0x1197   :  { %v3821_v57 = vpop.eup %3820  ;;  %v2303_v30 = vmul.f32 0.5, %v3819_v14 }
0x1198   :  { %v2135_v31 = vmul.f32 0.5, %v3821_v57 }
0x1199   :  { %v2304_v37 = vadd.f32 0.5, %v2303_v30 }
0x119a   :  { %v2136_v44 = vadd.f32 0.5, %v2135_v31 }
0x119b   :  { %v2306_v46 = vmul.f32 %v2304_v37, %v4293_v1 }
0x119c   :  { %v2138_v51 = vmul.f32 %v2136_v44, %v4295_v5 }
0x1205   :  { %v2309_v40 = vpop.permute.xlu1 %2308 }
0x1206   :  { %v2311_v42 = vmul.f32 %v2309_v40, %v2304_v37 }
0x1208   :  { %2313 = vrot.lane.b32.xlu1 %v2311_v42, %s3854_s28  ;;  %v2141_v54 = vpop.permute.xlu0 %2140 }
0x1209   :  { %v2143_v45 = vmul.f32 %v2141_v54, %v2136_v44 }
0x120b   :  { %2145 = vrot.lane.b32.xlu0 %v2143_v45, %s3854_s28 }
0x127a   :  { %v2314_v48 = vpop.permute.xlu1 %2313 }
0x127b   :  { %v4341_v50 = vadd.f32 %v2314_v48, %v2306_v46 }
0x127d   :  { %3822 = vtanh.f32 %v4341_v50  ;;  %v2146_v58 = vpop.permute.xlu0 %2145 }
0x127e   :  { %v4345_v59 = vadd.f32 %v2146_v58, %v2138_v51 }
0x1280   :  { %3824 = vtanh.f32 %v4345_v59 }
0x1287   :  { %v3823_v60 = vpop.eup %3822 }
0x1288   :  { %2319 = vrot.lane.b32.xlu1 %v3823_v60, %s3853_s27 }
0x128a   :  { %v3825_v55 = vpop.eup %3824 }
0x128b   :  { %2151 = vrot.lane.b32.xlu0 %v3825_v55, %s3853_s27  ;;  %v3849_v55 = vld [vmem:[%s4439_s6] ss:$0 sm:$0xff] }
0x12fa   :  { %v2320_v62 = vpop.permute.xlu1 %2319 }
0x12fb   :  { %v2322_v63 = vmul.f32 %v2320_v62, %v2304_v37 }
0x12fd   :  { %2394 = vrot.lane.b32.xlu1 %v2322_v63, %s3854_s28  ;;  %v2152_v0 = vpop.permute.xlu0 %2151 }
0x12fe   :  { %v2154_v1 = vmul.f32 %v2152_v0, %v2136_v44 }
0x1300   :  { %2156 = vrot.lane.b32.xlu0 %v2154_v1, %s3854_s28 }
0x136f   :  { %v2395_v3 = vpop.permute.xlu1 %2394 }
0x1370   :  { %3485 = vmatmul.mubr.msk.f32.vlgmr.msra.gmra.mrb[32].mxu0 %vm210_vm2, %v2395_v3 }
0x1371   :  { %3716 = vmatpush3.bf16.msra.mxu0 %v3928_v8  ;;  %3506 = vmatprep.mubr.msk.f32.mxu0 %vm3851_vm1, %v3852_v4 }
0x1372   :  { %3717 = vmatprep.subr.bf16.mxu0 %v3850_v2  ;;  %v2157_v5 = vpop.permute.xlu0 %2156 }
0x1373   :  { %3452 = vmatmul.mubr.msk.f32.vlgmr.msra.gmra.mrb[24].mxu1 %vm210_vm2, %v2157_v5 }
0x1374   :  { %3698 = vmatpush3.bf16.msra.mxu1 %v3999_v41  ;;  %3473 = vmatprep.mubr.msk.f32.mxu1 %vm3851_vm1, %v3852_v4 }
0x1375   :  { %3719 = vmatpush3.bf16.msra.mxu0 %v3941_v12  ;;  %3699 = vmatprep.subr.bf16.mxu1 %v3850_v2 }
0x1376   :  { %3726 = vmatprep.subr.bf16.mxu0 %v3850_v2 }
0x1378   :  { %3507 = vmatmul.mubr.msk.f32.vlgmr.msra.gmra.mrb[34].mxu0 %vm210_vm2, %v2395_v3  ;;  %3701 = vmatpush3.bf16.msra.mxu1 %v4018_v47 }
0x1379   :  { %3728 = vmatpush3.bf16.msra.mxu0 %v3983_v36  ;;  %3708 = vmatprep.subr.bf16.mxu1 %v3850_v2 }
0x137a   :  { %3729 = vmatprep.subr.bf16.mxu0 %v3850_v2  ;;  %3528 = vmatprep.mubr.msk.f32.mxu0 %vm3851_vm1, %v3852_v4 }
0x137b   :  { %3474 = vmatmul.mubr.msk.f32.vlgmr.msra.gmra.mrb[26].mxu1 %vm210_vm2, %v2157_v5 }
0x137c   :  { %3710 = vmatpush3.bf16.msra.mxu1 %v4092_v35  ;;  %3495 = vmatprep.mubr.msk.f32.mxu1 %vm3851_vm1, %v3852_v4 }
0x137d   :  { %3731 = vmatpush3.bf16.msra.mxu0 %v4005_v43  ;;  %3711 = vmatprep.subr.bf16.mxu1 %v3850_v2 }
0x1380   :  { %3713 = vmatpush3.bf16.msra.mxu1 %v4098_v38 }
0x1381   :  { %3720 = vmatprep.subr.bf16.mxu1 %v3850_v2 }
0x1443   :  { %v2464_v8 = vpop.f32.mrb[32].mxu0 }
0x1444   :  { %v3486_v12 = vpop.f32.mrb[33].mxu0 }
0x1446   :  { %v4379_v36 = vpop.f32.mrb[24].mxu1 }
0x1447   :  { %v3453_v52 = vpop.f32.mrb[25].mxu1 }
0x1448   :  { %v2961_v52 = vld [vmem:[%s4441_s8] ss:$0 sm:$0xff]  ;;  %s3858_s8 = smov 96  }
0x1449   :  { %v883_v6 = vadd.f32 %v2961_v52, %v4184_v39  ;;  %v1891_v39 = vadd.f32 %v2961_v52, %v4331_v18 }
0x144b   :  { %v2632_v9 = vpop.f32.mrb[34].mxu0 }
0x144c   :  { %v2636_v10 = vadd.f32 %v2632_v9, %v207_v7  ;;  %v3508_v43 = vpop.f32.mrb[35].mxu0  ;;  %v1555_v7 = vadd.f32 %v2961_v52, %v4282_v22  ;;  %v2227_v9 = vadd.f32 %v2961_v52, %v4379_v36 }
0x144e   :  { %3826 = vtanh.f32 %v2636_v10  ;;  %v2389_v13 = vpop.f32.mrb[26].mxu1  ;;  %v2637_v20 = vmul.f32 0.5, %v2636_v10 }
0x144f   :  { %v2465_v11 = vadd.f32 %v2464_v8, %v2389_v13  ;;  %v3475_v16 = vpop.f32.mrb[27].mxu1  ;;  %v1219_v13 = vadd.f32 %v2961_v52, %v4233_v32  ;;  %v547_v32 = vadd.f32 %v2961_v52, %v4135_v49 }
0x1451   :  { %v2468_v17 = vadd.f32 %v4067_v61, %v2465_v11 }
0x1453   :  { %3828 = vtanh.f32 %v2468_v17  ;;  %v2469_v15 = vmul.f32 0.5, %v2468_v17 }
0x1454   :  { %3830 = vtanh.f32 %v2637_v20 }
0x1455   :  { %3832 = vtanh.f32 %v2469_v15 }
0x1458   :  { %v3827_v53 = vpop.eup %3826 }
0x1459   :  { %2644 = vrot.lane.b32.xlu1 %v3827_v53, %s3853_s27 }
0x145d   :  { %v3829_v19 = vpop.eup %3828 }
0x145e   :  { %2476 = vrot.lane.b32.xlu0 %v3829_v19, %s3853_s27  ;;  %v3831_v56 = vpop.eup %3830 }
0x145f   :  { %v2639_v21 = vmul.f32 0.5, %v3831_v56  ;;  %v3833_v23 = vpop.eup %3832 }
0x1460   :  { %v2471_v26 = vmul.f32 0.5, %v3833_v23 }
0x1461   :  { %v2640_v24 = vadd.f32 0.5, %v2639_v21 }
0x1462   :  { %v2472_v61 = vadd.f32 0.5, %v2471_v26 }
0x1463   :  { %v2642_v27 = vmul.f32 %v2640_v24, %v4341_v50 }
0x1464   :  { %v2474_v57 = vmul.f32 %v2472_v61, %v4345_v59 }
0x14cb   :  { %v2645_v25 = vpop.permute.xlu1 %2644 }
0x14cc   :  { %v2647_v28 = vmul.f32 %v2645_v25, %v2640_v24 }
0x14ce   :  { %2649 = vrot.lane.b32.xlu1 %v2647_v28, %s3854_s28 }
0x14d0   :  { %v2477_v29 = vpop.permute.xlu0 %2476 }
0x14d1   :  { %v2479_v33 = vmul.f32 %v2477_v29, %v2472_v61 }
0x14d3   :  { %2481 = vrot.lane.b32.xlu0 %v2479_v33, %s3854_s28 }
0x1540   :  { %v2650_v34 = vpop.permute.xlu1 %2649 }
0x1541   :  { %v2652_v14 = vadd.f32 %v2650_v34, %v2642_v27 }
0x1543   :  { %3834 = vtanh.f32 %v2652_v14 }
0x1545   :  { %v2482_v30 = vpop.permute.xlu0 %2481 }
0x1546   :  { %v2484_v31 = vadd.f32 %v2482_v30, %v2474_v57 }
0x1548   :  { %3836 = vtanh.f32 %v2484_v31 }
0x154d   :  { %v3835_v37 = vpop.eup %3834 }
0x154e   :  { %2655 = vrot.lane.b32.xlu1 %v3835_v37, %s3853_s27 }
0x1552   :  { %v3837_v40 = vpop.eup %3836 }
0x1553   :  { %2487 = vrot.lane.b32.xlu0 %v3837_v40, %s3853_s27 }
0x15c0   :  { %v2656_v42 = vpop.permute.xlu1 %2655 }
0x15c1   :  { %v2658_v44 = vmul.f32 %v2656_v42, %v2640_v24 }
0x15c3   :  { %2730 = vrot.lane.b32.xlu1 %v2658_v44, %s3854_s28 }
0x15c5   :  { %v2488_v54 = vpop.permute.xlu0 %2487 }
0x15c6   :  { %v2490_v45 = vmul.f32 %v2488_v54, %v2472_v61 }
0x15c8   :  { %2492 = vrot.lane.b32.xlu0 %v2490_v45, %s3854_s28 }
0x1635   :  { %v2731_v46 = vpop.permute.xlu1 %2730 }
0x1636   :  { %3529 = vmatmul.mubr.msk.f32.vlgmr.msra.gmra.mrb[36].mxu0 %vm210_vm2, %v2731_v46 }
0x163a   :  { %v2493_v48 = vpop.permute.xlu0 %2492 }
0x163b   :  { %3496 = vmatmul.mubr.msk.f32.vlgmr.msra.gmra.mrb[28].mxu1 %vm210_vm2, %v2493_v48 }
0x163c   :  { %3722 = vmatpush3.bf16.msra.mxu1 %v3999_v41  ;;  %3517 = vmatprep.mubr.msk.f32.mxu1 %vm3851_vm1, %v3852_v4 }
0x163d   :  { %3723 = vmatprep.subr.bf16.mxu1 %v3850_v2 }
0x1640   :  { %3725 = vmatpush3.bf16.msra.mxu1 %v4018_v47 }
0x1641   :  { %3732 = vmatprep.subr.bf16.mxu1 %v3850_v2 }
0x1643   :  { %3518 = vmatmul.mubr.msk.f32.vlgmr.msra.gmra.mrb[30].mxu1 %vm210_vm2, %v2493_v48 }
0x1644   :  { %3734 = vmatpush3.bf16.msra.mxu1 %v4092_v35  ;;  %3539 = vmatprep.mubr.msk.f32.mxu1 %vm3851_vm1, %v3852_v4 }
0x1645   :  { %3735 = vmatprep.subr.bf16.mxu1 %v3850_v2 }
0x1648   :  { %3737 = vmatpush3.bf16.msra.mxu1 %v4098_v38 }
0x1709   :  { %v2800_v41 = vpop.f32.mrb[36].mxu0 }
0x170a   :  { %v3530_v50 = vpop.f32.mrb[37].mxu0 }
0x170e   :  { %v2562_v51 = vpop.f32.mrb[28].mxu1 }
0x170f   :  { %v3497_v58 = vpop.f32.mrb[29].mxu1  ;;  %v2563_v11 = vadd.f32 %v2961_v52, %v2562_v51 }
0x1716   :  { %v2725_v59 = vpop.f32.mrb[30].mxu1 }
0x1717   :  { %v2801_v60 = vadd.f32 %v2800_v41, %v2725_v59  ;;  %v3519_v47 = vpop.f32.mrb[31].mxu1 }
0x1719   :  { %v2804_v62 = vadd.f32 %v3849_v55, %v2801_v60 }
0x171b   :  { %3838 = vtanh.f32 %v2804_v62  ;;  %v2805_v4 = vmul.f32 0.5, %v2804_v62 }
0x171d   :  { %3840 = vtanh.f32 %v2805_v4 }
0x1725   :  { %v3839_v35 = vpop.eup %3838 }
0x1726   :  { %2812 = vrot.lane.b32.xlu0 %v3839_v35, %s3853_s27 }
0x1727   :  { %v3841_v2 = vpop.eup %3840 }
0x1728   :  { %v2807_v38 = vmul.f32 0.5, %v3841_v2 }
0x172a   :  { %v2808_v63 = vadd.f32 0.5, %v2807_v38 }
0x172c   :  { %v2810_v3 = vmul.f32 %v2808_v63, %v2484_v31 }
0x1798   :  { %v2813_v0 = vpop.permute.xlu0 %2812 }
0x1799   :  { %v2815_v1 = vmul.f32 %v2813_v0, %v2808_v63 }
0x179b   :  { %2817 = vrot.lane.b32.xlu1 %v2815_v1, %s3854_s28 }
0x180d   :  { %v2818_v5 = vpop.permute.xlu1 %2817 }
0x180e   :  { %v2820_v8 = vadd.f32 %v2818_v5, %v2810_v3 }
0x1810   :  { %3842 = vtanh.f32 %v2820_v8 }
0x181a   :  { %v3843_v12 = vpop.eup %3842 }
0x181b   :  { %2823 = vrot.lane.b32.xlu0 %v3843_v12, %s3853_s27 }
0x181f   :  { %2903 = vrot.lane.b32.xlu0 %v883_v6, %s3855_s1 }
0x1823   :  { %2911 = vrot.lane.b32.xlu0 %v1555_v7, %s3856_s25 }
0x1827   :  { %2919 = vrot.lane.b32.xlu0 %v2227_v9, %s3857_s3 }
0x188d   :  { %v2824_v10 = vpop.permute.xlu0 %2823 }
0x188e   :  { %v2826_v43 = vmul.f32 %v2824_v10, %v2808_v63 }
0x1890   :  { %2828 = vrot.lane.b32.xlu1 %v2826_v43, %s3854_s28 }
0x1891   :  { %v2904_v53 = vpop.permute.xlu0 %2903 }
0x1892   :  { %v2931_v18 = vsel %vm2930_vm3, %v547_v32, %v2904_v53 }
0x1894   :  { %2907 = vrot.lane.b32.xlu1 %v1219_v13, %s3854_s28 }
0x1895   :  { %v2912_v20 = vpop.permute.xlu0 %2911 }
0x1898   :  { %2915 = vrot.lane.b32.xlu1 %v1891_v39, %s3853_s27 }
0x1899   :  { %v2920_v23 = vpop.permute.xlu0 %2919 }
0x189c   :  { %2923 = vrot.lane.b32.xlu1 %v2563_v11, %s3858_s8 }
0x1902   :  { %v2829_v22 = vpop.permute.xlu1 %2828 }
0x1903   :  { %3540 = vmatmul.mubr.msk.f32.vlgmr.msra.gmra.mrb[32].mxu1 %vm210_vm2, %v2829_v22 }
0x1906   :  { %v2908_v19 = vpop.permute.xlu1 %2907 }
0x1907   :  { %v2932_v56 = vsel %vm210_vm2, %v2931_v18, %v2908_v19 }
0x1908   :  { %v2934_v21 = vsel %vm2933_vm4, %v2932_v56, %v2912_v20 }
0x190a   :  { %v2916_v15 = vpop.permute.xlu1 %2915 }
0x190b   :  { %v2936_v24 = vsel %vm2935_vm5, %v2934_v21, %v2916_v15 }
0x190c   :  { %v2938_v26 = vsel %vm2937_vm6, %v2936_v24, %v2920_v23 }
0x190e   :  { %v2924_v25 = vpop.permute.xlu1 %2923 }
0x190f   :  { %v2940_v28 = vsel %vm2939_vm7, %v2938_v26, %v2924_v25 }
0x19d6   :  { %v2898_v36 = vpop.f32.mrb[32].mxu1 }
0x19d7   :  { %v2899_v16 = vadd.f32 %v2961_v52, %v2898_v36  ;;  %v3541_v17 = vpop.f32.mrb[33].mxu1 }
0x19d9   :  { %2927 = vrot.lane.b32.xlu0 %v2899_v16, %s3859_s26 }
0x1a4b   :  { %v2928_v61 = vpop.permute.xlu0 %2927 }
0x1a4c   :  { %v2942_v29 = vsel %vm2941_vm8, %v2940_v28, %v2928_v61 }
0x1a4d   :  { %v2943_v33 = vmul.f32 %v2942_v29, %v2942_v29 }
0x1a4f   :  { %2944 = vadd.xlane.f32.xlu1 %v2943_v33 }
0x1adc   :  { %v2945_v49 = vpop.xlane.xlu1 %2944 }
0x1add   :  { %3844 = vrsqrt.f32 %v2945_v49  ;;  %vm2948_vm9 = vcmp.eq.f32.partialorder %v2945_v49, inf  ;;  %v2951_v14 = vand.u32 2147483648, %v2945_v49  ;;  %vm2950_vm10 = vcmp.eq.f32.partialorder %v2945_v49, 0.0 }
0x1ae7   :  { %v3845_v27 = vpop.eup %3844 }
0x1ae8   :  { %v2947_v34 = vmul.f32 %v3845_v27, %v2945_v49 }
0x1aea   :  { %v2949_v57 = vsel %vm2948_vm9, %v2945_v49, %v2947_v34 }
0x1aeb   :  { %v2952_v30 = vsel %vm2950_vm10, %v2951_v14, %v2949_v57 }
0x1aec   :  { %3846 = vrcp.f32 %v2952_v30 }
0x1af6   :  { %v3847_v31 = vpop.eup %3846 }
0x1af7   :  { %v2954_v37 = vmul.f32 %v3847_v31, %v2942_v29 }
0x1af9   :  { %2955 = vst [vmem:[%s4442_s9] sm:$0xff] %v2954_v37 }

</bundles_post_ra>
